<compile_context>
chip_gen: v7x
topology: tpu7x:2x2x1
jax: 0.10.0
libtpu: 0.0.40
codegen_flags: <defaults>
</compile_context>

<pallas_src>
import functools

import jax
import jax.numpy as jnp
from jax.experimental import pallas as pl
from jax.experimental.pallas import tpu as pltpu


# ----------------------------------------------------------------------------
# Fused bidirectional LSTM layer kernel.
#   grid = (2,)  -> program_id(0) is the direction (0 = forward, 1 = backward)
#   x is presented as (NC, T*B, Cin) "chunks":
#       layer 0   : NC=1, chunk 0 = embedded tokens
#       layer >=1 : NC=2, chunk 0 = prev-layer fwd outputs, chunk 1 = bwd outputs
#   so x @ W_ih is computed as sum_k chunk_k @ W_ih_chunk_k (== concat semantics).
# ----------------------------------------------------------------------------
def _bilstm_kernel(T, B, H, NC,
                   len_ref, x_ref, wih_ref, whh_ref, b_ref,
                   out_ref, hlast_ref, gates_scr):
    d = pl.program_id(0)                           # 0 = forward, 1 = backward

    # ---- Prologue: hoisted input projection for ALL timesteps (one big bf16
    # MXU matmul per input chunk), accumulated in f32 together with the bias.
    proj = b_ref[...].astype(jnp.float32)          # (1, 4H) -> broadcasts
    for k in range(NC):                            # NC is static (1 or 2)
        proj = proj + jnp.dot(x_ref[k], wih_ref[k],
                              preferred_element_type=jnp.float32)
    gates_scr[...] = proj                          # (T*B, 4H) f32 in VMEM

    whh = whh_ref[...]                             # (H, 4H) bf16, loaded once
    blen = len_ref[...]                            # (B, 1) int32

    h0 = jnp.zeros((B, H), jnp.float32)
    c0 = jnp.zeros((B, H), jnp.float32)

    def step(s, carry):
        h, c = carry
        # real timestep of this iteration for the current direction
        t = jnp.where(d == 0, s, T - 1 - s)
        row = pl.multiple_of(t * B, B)

        g = gates_scr[pl.ds(row, B), :] + jnp.dot(
            h.astype(jnp.bfloat16), whh, preferred_element_type=jnp.float32)

        i_g = jax.nn.sigmoid(g[:, 0 * H:1 * H])    # PyTorch gate order i,f,g,o
        f_g = jax.nn.sigmoid(g[:, 1 * H:2 * H])
        g_g = jnp.tanh(g[:, 2 * H:3 * H])
        o_g = jax.nn.sigmoid(g[:, 3 * H:4 * H])

        c_new = f_g * c + i_g * g_g
        h_new = o_g * jnp.tanh(c_new)

        # packed-sequence masking: only valid timesteps update the state
        valid = t < blen                           # (B, 1) bool
        h = jnp.where(valid, h_new, h)
        c = jnp.where(valid, c_new, c)

        # per-step store is VMEM-only; HBM writeback is one block DMA at the end
        out_ref[pl.ds(row, B), :] = jnp.where(valid, h, 0.0).astype(out_ref.dtype)
        return h, c

    h_fin, _ = jax.lax.fori_loop(0, T, step, (h0, c0), unroll=True)
    hlast_ref[...] = h_fin                         # final hidden (f32), written once


def bilstm_layer(x_stacked, lengths_2d, w_ih, w_hh, b):
    """One bidirectional LSTM layer.

    x_stacked : (NC, T*B, Cin) bf16  (NC=1 for layer 0, NC=2 afterwards)
    lengths_2d: (B, 1) int32
    w_ih      : (2, NC, Cin, 4H) bf16   (per-direction, chunked input weights)
    w_hh      : (2, H, 4H) bf16
    b         : (2, 1, 4H) f32          (b_ih + b_hh, per direction)

    Returns (outputs (2, T*B, H) bf16 [dir-major], final hidden (2, B, H) f32).
    """
    NC, TB, Cin = x_stacked.shape
    B = lengths_2d.shape[0]
    T = TB // B
    H = w_hh.shape[1]

    kernel = functools.partial(_bilstm_kernel, T, B, H, NC)

    out, h_last = pl.pallas_call(
        kernel,
        out_shape=(jax.ShapeDtypeStruct((2, TB, H), jnp.bfloat16),
                   jax.ShapeDtypeStruct((2, B, H), jnp.float32)),
        grid_spec=pltpu.PrefetchScalarGridSpec(
            num_scalar_prefetch=0,
            grid=(2,),                                              # direction
            in_specs=[
                pl.BlockSpec((B, 1), lambda d: (0, 0)),             # lengths
                pl.BlockSpec((NC, TB, Cin), lambda d: (0, 0, 0)),   # x (all T)
                pl.BlockSpec((None, NC, Cin, 4 * H),
                             lambda d: (d, 0, 0, 0)),               # W_ih^T
                pl.BlockSpec((None, H, 4 * H), lambda d: (d, 0, 0)),  # W_hh^T
                pl.BlockSpec((None, 1, 4 * H), lambda d: (d, 0, 0)),  # bias
            ],
            out_specs=(
                pl.BlockSpec((None, TB, H), lambda d: (d, 0, 0)),   # outputs
                pl.BlockSpec((None, B, H), lambda d: (d, 0, 0)),    # final h
            ),
            scratch_shapes=[pltpu.VMEM((TB, 4 * H), jnp.float32)],  # precomputed gates
        ),
        compiler_params=pltpu.CompilerParams(
            dimension_semantics=("parallel",)),     # fwd/bwd on separate TCs (v7x)
    )(lengths_2d, x_stacked, w_ih, w_hh, b)
    return out, h_last


# ----------------------------------------------------------------------------
# Parameter init (deterministic, synthetic) + full forward.
# ----------------------------------------------------------------------------
def init_params(key, vocab, E, H, O, n_layers, pad_idx):
    params = {}
    k_emb, kk = jax.random.split(key)
    emb = jax.random.normal(k_emb, (vocab, E), jnp.float32)
    emb = emb.at[pad_idx].set(0.0)                 # padding_idx row is zero
    params["embedding"] = emb

    scale = 1.0 / (H ** 0.5)
    layers = []
    for l in range(n_layers):
        in_size = E if l == 0 else 2 * H
        nc = 1 if l == 0 else 2
        cin = in_size // nc
        kk, k1, k2, k3, k4 = jax.random.split(kk, 5)
        w_ih = jax.random.uniform(k1, (2, in_size, 4 * H), jnp.float32, -scale, scale)
        w_hh = jax.random.uniform(k2, (2, H, 4 * H), jnp.float32, -scale, scale)
        b_ih = jax.random.uniform(k3, (2, 1, 4 * H), jnp.float32, -scale, scale)
        b_hh = jax.random.uniform(k4, (2, 1, 4 * H), jnp.float32, -scale, scale)
        layers.append({
            # chunked along the input dim: chunk 0 multiplies fwd features,
            # chunk 1 multiplies bwd features (== concat(fwd, bwd) ordering)
            "w_ih": w_ih.reshape(2, nc, cin, 4 * H).astype(jnp.bfloat16),
            "w_hh": w_hh.astype(jnp.bfloat16),
            "b": b_ih + b_hh,                      # f32, (2, 1, 4H)
        })
    params["lstm"] = layers

    fscale = 1.0 / ((2 * H) ** 0.5)
    kk, kf1, kf2 = jax.random.split(kk, 3)
    params["fc_w"] = jax.random.uniform(kf1, (2 * H, O), jnp.float32, -fscale, fscale)
    params["fc_b"] = jax.random.uniform(kf2, (1, O), jnp.float32, -fscale, fscale)
    return params


def rnn_forward(params, text, text_lengths):
    # text: (T, B) int32 token ids (seq-major, batch_first=False);
    # text_lengths: (B,) int32, sorted descending (pack_padded_sequence contract).
    T, B = text.shape
    emb = params["embedding"][text]                           # (T, B, E) gather (glue)
    lengths_2d = text_lengths.astype(jnp.int32).reshape(B, 1)

    # bf16 activations: matches the in-kernel bf16 MXU cast, halves HBM traffic.
    x = emb.astype(jnp.bfloat16).reshape(1, T * B, -1)        # (NC=1, T*B, E)
    h_last = None
    for layer in params["lstm"]:
        out, h_last = bilstm_layer(x, lengths_2d,
                                   layer["w_ih"], layer["w_hh"], layer["b"])
        x = out                    # (2, T*B, H): direction-major == next layer's chunks
        # TODO(synk): inter-layer LSTM dropout omitted (eval-mode identity).

    # torch.cat((hidden[-2], hidden[-1]), dim=1): last-layer fwd & bwd final states.
    hidden = jnp.concatenate([h_last[0], h_last[1]], axis=1)  # (B, 2H) f32
    # self.dropout(...) in eval mode is identity.
    # Final (B,2H)x(2H,O) linear left to XLA: a dedicated Pallas call's
    # launch/DMA overhead exceeds its compute at this size.
    return hidden @ params["fc_w"] + params["fc_b"]


if __name__ == "__main__":
    VOCAB, EMB, HID, OUT, N_LAYERS, PAD_IDX = 50, 32, 32, 2, 2, 1
    T, B = 8, 8

    key = jax.random.PRNGKey(0)
    k_params, k_text = jax.random.split(key)
    params = init_params(k_params, VOCAB, EMB, HID, OUT, N_LAYERS, PAD_IDX)

    lengths = jnp.array([8, 8, 7, 6, 5, 4, 3, 2], dtype=jnp.int32)   # sorted desc
    text = jax.random.randint(k_text, (T, B), 0, VOCAB, dtype=jnp.int32)
    tpos = jnp.arange(T)[:, None]
    text = jnp.where(tpos < lengths[None, :], text, PAD_IDX)         # pad tail

    logits = rnn_forward(params, text, lengths)
    jax.block_until_ready(logits)
    assert logits.shape == (B, OUT) and logits.dtype == jnp.float32
    print("KERNEL_OK")
</pallas_src>

<mosaic_0001>
module attributes {stable_mosaic.version = 11 : i64} {
  func.func @_bilstm_kernel(%arg0: i32, %arg1: memref<8x1xi32, #tpu.memory_space<vmem>>, %arg2: memref<1x64x32xbf16, #tpu.memory_space<vmem>>, %arg3: memref<1x1x32x128xbf16, #tpu.memory_space<vmem>>, %arg4: memref<1x32x128xbf16, #tpu.memory_space<vmem>>, %arg5: memref<1x1x128xf32, #tpu.memory_space<vmem>>, %arg6: memref<1x64x32xbf16, #tpu.memory_space<vmem>>, %arg7: memref<1x8x32xf32, #tpu.memory_space<vmem>>, %arg8: memref<64x128xf32, #tpu.memory_space<vmem>>) attributes {dimension_semantics = [#tpu.dimension_semantics<parallel>], iteration_bounds = array<i64: 2>, scalar_prefetch = 0 : i64, scratch_operands = 1 : i64, tpu.core_type = #tpu.core_type<tc>, window_params = [{pipeline_mode = #tpu.pipeline_mode<synchronous>, transform_indices = @transform_0, window_bounds = array<i64: 8, 1>}, {pipeline_mode = #tpu.pipeline_mode<synchronous>, transform_indices = @transform_1, window_bounds = array<i64: 1, 64, 32>}, {transform_indices = @transform_2, window_bounds = array<i64: 1, 1, 32, 128>}, {transform_indices = @transform_3, window_bounds = array<i64: 1, 32, 128>}, {transform_indices = @transform_4, window_bounds = array<i64: 1, 1, 128>}, {transform_indices = @transform_5, window_bounds = array<i64: 1, 64, 32>}, {transform_indices = @transform_6, window_bounds = array<i64: 1, 8, 32>}]} {
    %c0 = arith.constant 0 : index
    %c0_0 = arith.constant 0 : index
    %c0_1 = arith.constant 0 : index
    %0 = vector.load %arg5[%c0, %c0_0, %c0_1] : memref<1x1x128xf32, #tpu.memory_space<vmem>>, vector<1x1x128xf32>
    %1 = vector.shape_cast %0 : vector<1x1x128xf32> to vector<1x128xf32>
    %c0_2 = arith.constant 0 : index
    %c0_3 = arith.constant 0 : index
    %c0_4 = arith.constant 0 : index
    %2 = vector.load %arg2[%c0_2, %c0_3, %c0_4] : memref<1x64x32xbf16, #tpu.memory_space<vmem>>, vector<1x64x32xbf16>
    %3 = vector.shape_cast %2 : vector<1x64x32xbf16> to vector<64x32xbf16>
    %c0_5 = arith.constant 0 : index
    %c0_6 = arith.constant 0 : index
    %c0_7 = arith.constant 0 : index
    %c0_8 = arith.constant 0 : index
    %4 = vector.load %arg3[%c0_5, %c0_6, %c0_7, %c0_8] : memref<1x1x32x128xbf16, #tpu.memory_space<vmem>>, vector<1x1x32x128xbf16>
    %5 = vector.shape_cast %4 : vector<1x1x32x128xbf16> to vector<32x128xbf16>
    %cst = arith.constant dense<0.000000e+00> : vector<64x128xf32>
    %6 = tpu.matmul %3, %5, %cst {dimension_numbers = #tpu.dot_dimension_numbers<[1], [0], [0], [1], [0, 0, 1, 1], [], []>} : vector<64x32xbf16>, vector<32x128xbf16>, vector<64x128xf32> -> vector<64x128xf32>
    %7 = vector.broadcast %1 : vector<1x128xf32> to vector<64x128xf32>
    %8 = arith.addf %7, %6 : vector<64x128xf32>
    %c0_9 = arith.constant 0 : index
    %c0_10 = arith.constant 0 : index
    %9 = vector.load %arg8[%c0_9, %c0_10] : memref<64x128xf32, #tpu.memory_space<vmem>>, vector<64x128xf32>
    tpu.vector_store %arg8[%c0_9, %c0_10], %8 {strides = array<i32>} : memref<64x128xf32, #tpu.memory_space<vmem>>, vector<64x128xf32>,
    %c0_11 = arith.constant 0 : index
    %c0_12 = arith.constant 0 : index
    %c0_13 = arith.constant 0 : index
    %10 = vector.load %arg4[%c0_11, %c0_12, %c0_13] : memref<1x32x128xbf16, #tpu.memory_space<vmem>>, vector<1x32x128xbf16>
    %11 = vector.shape_cast %10 : vector<1x32x128xbf16> to vector<32x128xbf16>
    %c0_14 = arith.constant 0 : index
    %c0_15 = arith.constant 0 : index
    %12 = vector.load %arg1[%c0_14, %c0_15] : memref<8x1xi32, #tpu.memory_space<vmem>>, vector<8x1xi32>
    %cst_16 = arith.constant 0.000000e+00 : f32
    %13 = vector.broadcast %cst_16 : f32 to vector<8x32xf32>
    %cst_17 = arith.constant 0.000000e+00 : f32
    %14 = vector.broadcast %cst_17 : f32 to vector<8x32xf32>
    %c0_i32 = arith.constant 0 : i32
    %c0_i32_18 = arith.constant 0 : i32
    %15 = arith.cmpi eq, %arg0, %c0_i32_18 : i32
    %c7_i32 = arith.constant 7 : i32
    %16 = arith.subi %c7_i32, %c0_i32 : i32
    %17 = arith.select %15, %c0_i32, %16 : i32
    %c8_i32 = arith.constant 8 : i32
    %18 = arith.muli %17, %c8_i32 : i32
    %19 = tpu.assume_multiple %18, 8 : i32
    %20 = arith.index_cast %19 : i32 to index
    %c0_19 = arith.constant 0 : index
    %21 = vector.load %arg8[%20, %c0_19] : memref<64x128xf32, #tpu.memory_space<vmem>>, vector<8x128xf32>
    %22 = arith.truncf %13 : vector<8x32xf32> to vector<8x32xbf16>
    %cst_20 = arith.constant dense<0.000000e+00> : vector<8x128xf32>
    %23 = tpu.matmul %22, %11, %cst_20 {dimension_numbers = #tpu.dot_dimension_numbers<[1], [0], [0], [1], [0, 0, 1, 1], [], []>} : vector<8x32xbf16>, vector<32x128xbf16>, vector<8x128xf32> -> vector<8x128xf32>
    %24 = arith.addf %21, %23 : vector<8x128xf32>
    %25 = vector.extract_strided_slice %24 {offsets = [0, 0], sizes = [8, 32], strides = [1, 1]} : vector<8x128xf32> to vector<8x32xf32>
    %26 = arith.negf %25 : vector<8x32xf32>
    %27 = math.exp %26 : vector<8x32xf32>
    %cst_21 = arith.constant 1.000000e+00 : f32
    %28 = vector.broadcast %cst_21 : f32 to vector<8x32xf32>
    %29 = arith.addf %28, %27 : vector<8x32xf32>
    %30 = arith.divf %28, %29 : vector<8x32xf32>
    %31 = vector.extract_strided_slice %24 {offsets = [0, 32], sizes = [8, 32], strides = [1, 1]} : vector<8x128xf32> to vector<8x32xf32>
    %32 = arith.negf %31 : vector<8x32xf32>
    %33 = math.exp %32 : vector<8x32xf32>
    %cst_22 = arith.constant 1.000000e+00 : f32
    %34 = vector.broadcast %cst_22 : f32 to vector<8x32xf32>
    %35 = arith.addf %34, %33 : vector<8x32xf32>
    %36 = arith.divf %34, %35 : vector<8x32xf32>
    %37 = vector.extract_strided_slice %24 {offsets = [0, 64], sizes = [8, 32], strides = [1, 1]} : vector<8x128xf32> to vector<8x32xf32>
    %38 = math.tanh %37 : vector<8x32xf32>
    %39 = vector.extract_strided_slice %24 {offsets = [0, 96], sizes = [8, 32], strides = [1, 1]} : vector<8x128xf32> to vector<8x32xf32>
    %40 = arith.negf %39 : vector<8x32xf32>
    %41 = math.exp %40 : vector<8x32xf32>
    %cst_23 = arith.constant 1.000000e+00 : f32
    %42 = vector.broadcast %cst_23 : f32 to vector<8x32xf32>
    %43 = arith.addf %42, %41 : vector<8x32xf32>
    %44 = arith.divf %42, %43 : vector<8x32xf32>
    %45 = arith.mulf %36, %14 : vector<8x32xf32>
    %46 = arith.mulf %30, %38 : vector<8x32xf32>
    %47 = arith.addf %45, %46 : vector<8x32xf32>
    %48 = math.tanh %47 : vector<8x32xf32>
    %49 = arith.mulf %44, %48 : vector<8x32xf32>
    %50 = vector.broadcast %17 : i32 to vector<8x1xi32>
    %51 = arith.cmpi slt, %50, %12 : vector<8x1xi32>
    %52 = vector.shape_cast %51 : vector<8x1xi1> to vector<8x1xi1>
    %53 = vector.broadcast %52 : vector<8x1xi1> to vector<8x32xi1>
    %54 = arith.select %53, %49, %13 : vector<8x32xi1>, vector<8x32xf32>
    %55 = vector.shape_cast %51 : vector<8x1xi1> to vector<8x1xi1>
    %56 = vector.broadcast %55 : vector<8x1xi1> to vector<8x32xi1>
    %57 = arith.select %56, %47, %14 : vector<8x32xi1>, vector<8x32xf32>
    %cst_24 = arith.constant 0.000000e+00 : f32
    %58 = vector.shape_cast %51 : vector<8x1xi1> to vector<8x1xi1>
    %59 = vector.broadcast %58 : vector<8x1xi1> to vector<8x32xi1>
    %60 = vector.broadcast %cst_24 : f32 to vector<8x32xf32>
    %61 = arith.select %59, %54, %60 : vector<8x32xi1>, vector<8x32xf32>
    %62 = arith.truncf %61 : vector<8x32xf32> to vector<8x32xbf16>
    %c0_25 = arith.constant 0 : index
    %63 = arith.index_cast %19 : i32 to index
    %c0_26 = arith.constant 0 : index
    %64 = vector.load %arg6[%c0_25, %63, %c0_26] : memref<1x64x32xbf16, #tpu.memory_space<vmem>>, vector<1x8x32xbf16>
    %65 = vector.shape_cast %64 : vector<1x8x32xbf16> to vector<8x32xbf16>
    %66 = vector.shape_cast %62 : vector<8x32xbf16> to vector<1x8x32xbf16>
    tpu.vector_store %arg6[%c0_25, %63, %c0_26], %66 {strides = array<i32>} : memref<1x64x32xbf16, #tpu.memory_space<vmem>>, vector<1x8x32xbf16>,
    %c1_i32 = arith.constant 1 : i32
    %c0_i32_27 = arith.constant 0 : i32
    %67 = arith.cmpi eq, %arg0, %c0_i32_27 : i32
    %c7_i32_28 = arith.constant 7 : i32
    %68 = arith.subi %c7_i32_28, %c1_i32 : i32
    %69 = arith.select %67, %c1_i32, %68 : i32
    %c8_i32_29 = arith.constant 8 : i32
    %70 = arith.muli %69, %c8_i32_29 : i32
    %71 = tpu.assume_multiple %70, 8 : i32
    %72 = arith.index_cast %71 : i32 to index
    %c0_30 = arith.constant 0 : index
    %73 = vector.load %arg8[%72, %c0_30] : memref<64x128xf32, #tpu.memory_space<vmem>>, vector<8x128xf32>
    %74 = arith.truncf %54 : vector<8x32xf32> to vector<8x32xbf16>
    %cst_31 = arith.constant dense<0.000000e+00> : vector<8x128xf32>
    %75 = tpu.matmul %74, %11, %cst_31 {dimension_numbers = #tpu.dot_dimension_numbers<[1], [0], [0], [1], [0, 0, 1, 1], [], []>} : vector<8x32xbf16>, vector<32x128xbf16>, vector<8x128xf32> -> vector<8x128xf32>
    %76 = arith.addf %73, %75 : vector<8x128xf32>
    %77 = vector.extract_strided_slice %76 {offsets = [0, 0], sizes = [8, 32], strides = [1, 1]} : vector<8x128xf32> to vector<8x32xf32>
    %78 = arith.negf %77 : vector<8x32xf32>
    %79 = math.exp %78 : vector<8x32xf32>
    %cst_32 = arith.constant 1.000000e+00 : f32
    %80 = vector.broadcast %cst_32 : f32 to vector<8x32xf32>
    %81 = arith.addf %80, %79 : vector<8x32xf32>
    %82 = arith.divf %80, %81 : vector<8x32xf32>
    %83 = vector.extract_strided_slice %76 {offsets = [0, 32], sizes = [8, 32], strides = [1, 1]} : vector<8x128xf32> to vector<8x32xf32>
    %84 = arith.negf %83 : vector<8x32xf32>
    %85 = math.exp %84 : vector<8x32xf32>
    %cst_33 = arith.constant 1.000000e+00 : f32
    %86 = vector.broadcast %cst_33 : f32 to vector<8x32xf32>
    %87 = arith.addf %86, %85 : vector<8x32xf32>
    %88 = arith.divf %86, %87 : vector<8x32xf32>
    %89 = vector.extract_strided_slice %76 {offsets = [0, 64], sizes = [8, 32], strides = [1, 1]} : vector<8x128xf32> to vector<8x32xf32>
    %90 = math.tanh %89 : vector<8x32xf32>
    %91 = vector.extract_strided_slice %76 {offsets = [0, 96], sizes = [8, 32], strides = [1, 1]} : vector<8x128xf32> to vector<8x32xf32>
    %92 = arith.negf %91 : vector<8x32xf32>
    %93 = math.exp %92 : vector<8x32xf32>
    %cst_34 = arith.constant 1.000000e+00 : f32
    %94 = vector.broadcast %cst_34 : f32 to vector<8x32xf32>
    %95 = arith.addf %94, %93 : vector<8x32xf32>
    %96 = arith.divf %94, %95 : vector<8x32xf32>
    %97 = arith.mulf %88, %57 : vector<8x32xf32>
    %98 = arith.mulf %82, %90 : vector<8x32xf32>
    %99 = arith.addf %97, %98 : vector<8x32xf32>
    %100 = math.tanh %99 : vector<8x32xf32>
    %101 = arith.mulf %96, %100 : vector<8x32xf32>
    %102 = vector.broadcast %69 : i32 to vector<8x1xi32>
    %103 = arith.cmpi slt, %102, %12 : vector<8x1xi32>
    %104 = vector.shape_cast %103 : vector<8x1xi1> to vector<8x1xi1>
    %105 = vector.broadcast %104 : vector<8x1xi1> to vector<8x32xi1>
    %106 = arith.select %105, %101, %54 : vector<8x32xi1>, vector<8x32xf32>
    %107 = vector.shape_cast %103 : vector<8x1xi1> to vector<8x1xi1>
    %108 = vector.broadcast %107 : vector<8x1xi1> to vector<8x32xi1>
    %109 = arith.select %108, %99, %57 : vector<8x32xi1>, vector<8x32xf32>
    %cst_35 = arith.constant 0.000000e+00 : f32
    %110 = vector.shape_cast %103 : vector<8x1xi1> to vector<8x1xi1>
    %111 = vector.broadcast %110 : vector<8x1xi1> to vector<8x32xi1>
    %112 = vector.broadcast %cst_35 : f32 to vector<8x32xf32>
    %113 = arith.select %111, %106, %112 : vector<8x32xi1>, vector<8x32xf32>
    %114 = arith.truncf %113 : vector<8x32xf32> to vector<8x32xbf16>
    %c0_36 = arith.constant 0 : index
    %115 = arith.index_cast %71 : i32 to index
    %c0_37 = arith.constant 0 : index
    %116 = vector.load %arg6[%c0_36, %115, %c0_37] : memref<1x64x32xbf16, #tpu.memory_space<vmem>>, vector<1x8x32xbf16>
    %117 = vector.shape_cast %116 : vector<1x8x32xbf16> to vector<8x32xbf16>
    %118 = vector.shape_cast %114 : vector<8x32xbf16> to vector<1x8x32xbf16>
    tpu.vector_store %arg6[%c0_36, %115, %c0_37], %118 {strides = array<i32>} : memref<1x64x32xbf16, #tpu.memory_space<vmem>>, vector<1x8x32xbf16>,
    %c2_i32 = arith.constant 2 : i32
    %c0_i32_38 = arith.constant 0 : i32
    %119 = arith.cmpi eq, %arg0, %c0_i32_38 : i32
    %c7_i32_39 = arith.constant 7 : i32
    %120 = arith.subi %c7_i32_39, %c2_i32 : i32
    %121 = arith.select %119, %c2_i32, %120 : i32
    %c8_i32_40 = arith.constant 8 : i32
    %122 = arith.muli %121, %c8_i32_40 : i32
    %123 = tpu.assume_multiple %122, 8 : i32
    %124 = arith.index_cast %123 : i32 to index
    %c0_41 = arith.constant 0 : index
    %125 = vector.load %arg8[%124, %c0_41] : memref<64x128xf32, #tpu.memory_space<vmem>>, vector<8x128xf32>
    %126 = arith.truncf %106 : vector<8x32xf32> to vector<8x32xbf16>
    %cst_42 = arith.constant dense<0.000000e+00> : vector<8x128xf32>
    %127 = tpu.matmul %126, %11, %cst_42 {dimension_numbers = #tpu.dot_dimension_numbers<[1], [0], [0], [1], [0, 0, 1, 1], [], []>} : vector<8x32xbf16>, vector<32x128xbf16>, vector<8x128xf32> -> vector<8x128xf32>
    %128 = arith.addf %125, %127 : vector<8x128xf32>
    %129 = vector.extract_strided_slice %128 {offsets = [0, 0], sizes = [8, 32], strides = [1, 1]} : vector<8x128xf32> to vector<8x32xf32>
    %130 = arith.negf %129 : vector<8x32xf32>
    %131 = math.exp %130 : vector<8x32xf32>
    %cst_43 = arith.constant 1.000000e+00 : f32
    %132 = vector.broadcast %cst_43 : f32 to vector<8x32xf32>
    %133 = arith.addf %132, %131 : vector<8x32xf32>
    %134 = arith.divf %132, %133 : vector<8x32xf32>
    %135 = vector.extract_strided_slice %128 {offsets = [0, 32], sizes = [8, 32], strides = [1, 1]} : vector<8x128xf32> to vector<8x32xf32>
    %136 = arith.negf %135 : vector<8x32xf32>
    %137 = math.exp %136 : vector<8x32xf32>
    %cst_44 = arith.constant 1.000000e+00 : f32
    %138 = vector.broadcast %cst_44 : f32 to vector<8x32xf32>
    %139 = arith.addf %138, %137 : vector<8x32xf32>
    %140 = arith.divf %138, %139 : vector<8x32xf32>
    %141 = vector.extract_strided_slice %128 {offsets = [0, 64], sizes = [8, 32], strides = [1, 1]} : vector<8x128xf32> to vector<8x32xf32>
    %142 = math.tanh %141 : vector<8x32xf32>
    %143 = vector.extract_strided_slice %128 {offsets = [0, 96], sizes = [8, 32], strides = [1, 1]} : vector<8x128xf32> to vector<8x32xf32>
    %144 = arith.negf %143 : vector<8x32xf32>
    %145 = math.exp %144 : vector<8x32xf32>
    %cst_45 = arith.constant 1.000000e+00 : f32
    %146 = vector.broadcast %cst_45 : f32 to vector<8x32xf32>
    %147 = arith.addf %146, %145 : vector<8x32xf32>
    %148 = arith.divf %146, %147 : vector<8x32xf32>
    %149 = arith.mulf %140, %109 : vector<8x32xf32>
    %150 = arith.mulf %134, %142 : vector<8x32xf32>
    %151 = arith.addf %149, %150 : vector<8x32xf32>
    %152 = math.tanh %151 : vector<8x32xf32>
    %153 = arith.mulf %148, %152 : vector<8x32xf32>
    %154 = vector.broadcast %121 : i32 to vector<8x1xi32>
    %155 = arith.cmpi slt, %154, %12 : vector<8x1xi32>
    %156 = vector.shape_cast %155 : vector<8x1xi1> to vector<8x1xi1>
    %157 = vector.broadcast %156 : vector<8x1xi1> to vector<8x32xi1>
    %158 = arith.select %157, %153, %106 : vector<8x32xi1>, vector<8x32xf32>
    %159 = vector.shape_cast %155 : vector<8x1xi1> to vector<8x1xi1>
    %160 = vector.broadcast %159 : vector<8x1xi1> to vector<8x32xi1>
    %161 = arith.select %160, %151, %109 : vector<8x32xi1>, vector<8x32xf32>
    %cst_46 = arith.constant 0.000000e+00 : f32
    %162 = vector.shape_cast %155 : vector<8x1xi1> to vector<8x1xi1>
    %163 = vector.broadcast %162 : vector<8x1xi1> to vector<8x32xi1>
    %164 = vector.broadcast %cst_46 : f32 to vector<8x32xf32>
    %165 = arith.select %163, %158, %164 : vector<8x32xi1>, vector<8x32xf32>
    %166 = arith.truncf %165 : vector<8x32xf32> to vector<8x32xbf16>
    %c0_47 = arith.constant 0 : index
    %167 = arith.index_cast %123 : i32 to index
    %c0_48 = arith.constant 0 : index
    %168 = vector.load %arg6[%c0_47, %167, %c0_48] : memref<1x64x32xbf16, #tpu.memory_space<vmem>>, vector<1x8x32xbf16>
    %169 = vector.shape_cast %168 : vector<1x8x32xbf16> to vector<8x32xbf16>
    %170 = vector.shape_cast %166 : vector<8x32xbf16> to vector<1x8x32xbf16>
    tpu.vector_store %arg6[%c0_47, %167, %c0_48], %170 {strides = array<i32>} : memref<1x64x32xbf16, #tpu.memory_space<vmem>>, vector<1x8x32xbf16>,
    %c3_i32 = arith.constant 3 : i32
    %c0_i32_49 = arith.constant 0 : i32
    %171 = arith.cmpi eq, %arg0, %c0_i32_49 : i32
    %c7_i32_50 = arith.constant 7 : i32
    %172 = arith.subi %c7_i32_50, %c3_i32 : i32
    %173 = arith.select %171, %c3_i32, %172 : i32
    %c8_i32_51 = arith.constant 8 : i32
    %174 = arith.muli %173, %c8_i32_51 : i32
    %175 = tpu.assume_multiple %174, 8 : i32
    %176 = arith.index_cast %175 : i32 to index
    %c0_52 = arith.constant 0 : index
    %177 = vector.load %arg8[%176, %c0_52] : memref<64x128xf32, #tpu.memory_space<vmem>>, vector<8x128xf32>
    %178 = arith.truncf %158 : vector<8x32xf32> to vector<8x32xbf16>
    %cst_53 = arith.constant dense<0.000000e+00> : vector<8x128xf32>
    %179 = tpu.matmul %178, %11, %cst_53 {dimension_numbers = #tpu.dot_dimension_numbers<[1], [0], [0], [1], [0, 0, 1, 1], [], []>} : vector<8x32xbf16>, vector<32x128xbf16>, vector<8x128xf32> -> vector<8x128xf32>
    %180 = arith.addf %177, %179 : vector<8x128xf32>
    %181 = vector.extract_strided_slice %180 {offsets = [0, 0], sizes = [8, 32], strides = [1, 1]} : vector<8x128xf32> to vector<8x32xf32>
    %182 = arith.negf %181 : vector<8x32xf32>
    %183 = math.exp %182 : vector<8x32xf32>
    %cst_54 = arith.constant 1.000000e+00 : f32
    %184 = vector.broadcast %cst_54 : f32 to vector<8x32xf32>
    %185 = arith.addf %184, %183 : vector<8x32xf32>
    %186 = arith.divf %184, %185 : vector<8x32xf32>
    %187 = vector.extract_strided_slice %180 {offsets = [0, 32], sizes = [8, 32], strides = [1, 1]} : vector<8x128xf32> to vector<8x32xf32>
    %188 = arith.negf %187 : vector<8x32xf32>
    %189 = math.exp %188 : vector<8x32xf32>
    %cst_55 = arith.constant 1.000000e+00 : f32
    %190 = vector.broadcast %cst_55 : f32 to vector<8x32xf32>
    %191 = arith.addf %190, %189 : vector<8x32xf32>
    %192 = arith.divf %190, %191 : vector<8x32xf32>
    %193 = vector.extract_strided_slice %180 {offsets = [0, 64], sizes = [8, 32], strides = [1, 1]} : vector<8x128xf32> to vector<8x32xf32>
    %194 = math.tanh %193 : vector<8x32xf32>
    %195 = vector.extract_strided_slice %180 {offsets = [0, 96], sizes = [8, 32], strides = [1, 1]} : vector<8x128xf32> to vector<8x32xf32>
    %196 = arith.negf %195 : vector<8x32xf32>
    %197 = math.exp %196 : vector<8x32xf32>
    %cst_56 = arith.constant 1.000000e+00 : f32
    %198 = vector.broadcast %cst_56 : f32 to vector<8x32xf32>
    %199 = arith.addf %198, %197 : vector<8x32xf32>
    %200 = arith.divf %198, %199 : vector<8x32xf32>
    %201 = arith.mulf %192, %161 : vector<8x32xf32>
    %202 = arith.mulf %186, %194 : vector<8x32xf32>
    %203 = arith.addf %201, %202 : vector<8x32xf32>
    %204 = math.tanh %203 : vector<8x32xf32>
    %205 = arith.mulf %200, %204 : vector<8x32xf32>
    %206 = vector.broadcast %173 : i32 to vector<8x1xi32>
    %207 = arith.cmpi slt, %206, %12 : vector<8x1xi32>
    %208 = vector.shape_cast %207 : vector<8x1xi1> to vector<8x1xi1>
    %209 = vector.broadcast %208 : vector<8x1xi1> to vector<8x32xi1>
    %210 = arith.select %209, %205, %158 : vector<8x32xi1>, vector<8x32xf32>
    %211 = vector.shape_cast %207 : vector<8x1xi1> to vector<8x1xi1>
    %212 = vector.broadcast %211 : vector<8x1xi1> to vector<8x32xi1>
    %213 = arith.select %212, %203, %161 : vector<8x32xi1>, vector<8x32xf32>
    %cst_57 = arith.constant 0.000000e+00 : f32
    %214 = vector.shape_cast %207 : vector<8x1xi1> to vector<8x1xi1>
    %215 = vector.broadcast %214 : vector<8x1xi1> to vector<8x32xi1>
    %216 = vector.broadcast %cst_57 : f32 to vector<8x32xf32>
    %217 = arith.select %215, %210, %216 : vector<8x32xi1>, vector<8x32xf32>
    %218 = arith.truncf %217 : vector<8x32xf32> to vector<8x32xbf16>
    %c0_58 = arith.constant 0 : index
    %219 = arith.index_cast %175 : i32 to index
    %c0_59 = arith.constant 0 : index
    %220 = vector.load %arg6[%c0_58, %219, %c0_59] : memref<1x64x32xbf16, #tpu.memory_space<vmem>>, vector<1x8x32xbf16>
    %221 = vector.shape_cast %220 : vector<1x8x32xbf16> to vector<8x32xbf16>
    %222 = vector.shape_cast %218 : vector<8x32xbf16> to vector<1x8x32xbf16>
    tpu.vector_store %arg6[%c0_58, %219, %c0_59], %222 {strides = array<i32>} : memref<1x64x32xbf16, #tpu.memory_space<vmem>>, vector<1x8x32xbf16>,
    %c4_i32 = arith.constant 4 : i32
    %c0_i32_60 = arith.constant 0 : i32
    %223 = arith.cmpi eq, %arg0, %c0_i32_60 : i32
    %c7_i32_61 = arith.constant 7 : i32
    %224 = arith.subi %c7_i32_61, %c4_i32 : i32
    %225 = arith.select %223, %c4_i32, %224 : i32
    %c8_i32_62 = arith.constant 8 : i32
    %226 = arith.muli %225, %c8_i32_62 : i32
    %227 = tpu.assume_multiple %226, 8 : i32
    %228 = arith.index_cast %227 : i32 to index
    %c0_63 = arith.constant 0 : index
    %229 = vector.load %arg8[%228, %c0_63] : memref<64x128xf32, #tpu.memory_space<vmem>>, vector<8x128xf32>
    %230 = arith.truncf %210 : vector<8x32xf32> to vector<8x32xbf16>
    %cst_64 = arith.constant dense<0.000000e+00> : vector<8x128xf32>
    %231 = tpu.matmul %230, %11, %cst_64 {dimension_numbers = #tpu.dot_dimension_numbers<[1], [0], [0], [1], [0, 0, 1, 1], [], []>} : vector<8x32xbf16>, vector<32x128xbf16>, vector<8x128xf32> -> vector<8x128xf32>
    %232 = arith.addf %229, %231 : vector<8x128xf32>
    %233 = vector.extract_strided_slice %232 {offsets = [0, 0], sizes = [8, 32], strides = [1, 1]} : vector<8x128xf32> to vector<8x32xf32>
    %234 = arith.negf %233 : vector<8x32xf32>
    %235 = math.exp %234 : vector<8x32xf32>
    %cst_65 = arith.constant 1.000000e+00 : f32
    %236 = vector.broadcast %cst_65 : f32 to vector<8x32xf32>
    %237 = arith.addf %236, %235 : vector<8x32xf32>
    %238 = arith.divf %236, %237 : vector<8x32xf32>
    %239 = vector.extract_strided_slice %232 {offsets = [0, 32], sizes = [8, 32], strides = [1, 1]} : vector<8x128xf32> to vector<8x32xf32>
    %240 = arith.negf %239 : vector<8x32xf32>
    %241 = math.exp %240 : vector<8x32xf32>
    %cst_66 = arith.constant 1.000000e+00 : f32
    %242 = vector.broadcast %cst_66 : f32 to vector<8x32xf32>
    %243 = arith.addf %242, %241 : vector<8x32xf32>
    %244 = arith.divf %242, %243 : vector<8x32xf32>
    %245 = vector.extract_strided_slice %232 {offsets = [0, 64], sizes = [8, 32], strides = [1, 1]} : vector<8x128xf32> to vector<8x32xf32>
    %246 = math.tanh %245 : vector<8x32xf32>
    %247 = vector.extract_strided_slice %232 {offsets = [0, 96], sizes = [8, 32], strides = [1, 1]} : vector<8x128xf32> to vector<8x32xf32>
    %248 = arith.negf %247 : vector<8x32xf32>
    %249 = math.exp %248 : vector<8x32xf32>
    %cst_67 = arith.constant 1.000000e+00 : f32
    %250 = vector.broadcast %cst_67 : f32 to vector<8x32xf32>
    %251 = arith.addf %250, %249 : vector<8x32xf32>
    %252 = arith.divf %250, %251 : vector<8x32xf32>
    %253 = arith.mulf %244, %213 : vector<8x32xf32>
    %254 = arith.mulf %238, %246 : vector<8x32xf32>
    %255 = arith.addf %253, %254 : vector<8x32xf32>
    %256 = math.tanh %255 : vector<8x32xf32>
    %257 = arith.mulf %252, %256 : vector<8x32xf32>
    %258 = vector.broadcast %225 : i32 to vector<8x1xi32>
    %259 = arith.cmpi slt, %258, %12 : vector<8x1xi32>
    %260 = vector.shape_cast %259 : vector<8x1xi1> to vector<8x1xi1>
    %261 = vector.broadcast %260 : vector<8x1xi1> to vector<8x32xi1>
    %262 = arith.select %261, %257, %210 : vector<8x32xi1>, vector<8x32xf32>
    %263 = vector.shape_cast %259 : vector<8x1xi1> to vector<8x1xi1>
    %264 = vector.broadcast %263 : vector<8x1xi1> to vector<8x32xi1>
    %265 = arith.select %264, %255, %213 : vector<8x32xi1>, vector<8x32xf32>
    %cst_68 = arith.constant 0.000000e+00 : f32
    %266 = vector.shape_cast %259 : vector<8x1xi1> to vector<8x1xi1>
    %267 = vector.broadcast %266 : vector<8x1xi1> to vector<8x32xi1>
    %268 = vector.broadcast %cst_68 : f32 to vector<8x32xf32>
    %269 = arith.select %267, %262, %268 : vector<8x32xi1>, vector<8x32xf32>
    %270 = arith.truncf %269 : vector<8x32xf32> to vector<8x32xbf16>
    %c0_69 = arith.constant 0 : index
    %271 = arith.index_cast %227 : i32 to index
    %c0_70 = arith.constant 0 : index
    %272 = vector.load %arg6[%c0_69, %271, %c0_70] : memref<1x64x32xbf16, #tpu.memory_space<vmem>>, vector<1x8x32xbf16>
    %273 = vector.shape_cast %272 : vector<1x8x32xbf16> to vector<8x32xbf16>
    %274 = vector.shape_cast %270 : vector<8x32xbf16> to vector<1x8x32xbf16>
    tpu.vector_store %arg6[%c0_69, %271, %c0_70], %274 {strides = array<i32>} : memref<1x64x32xbf16, #tpu.memory_space<vmem>>, vector<1x8x32xbf16>,
    %c5_i32 = arith.constant 5 : i32
    %c0_i32_71 = arith.constant 0 : i32
    %275 = arith.cmpi eq, %arg0, %c0_i32_71 : i32
    %c7_i32_72 = arith.constant 7 : i32
    %276 = arith.subi %c7_i32_72, %c5_i32 : i32
    %277 = arith.select %275, %c5_i32, %276 : i32
    %c8_i32_73 = arith.constant 8 : i32
    %278 = arith.muli %277, %c8_i32_73 : i32
    %279 = tpu.assume_multiple %278, 8 : i32
    %280 = arith.index_cast %279 : i32 to index
    %c0_74 = arith.constant 0 : index
    %281 = vector.load %arg8[%280, %c0_74] : memref<64x128xf32, #tpu.memory_space<vmem>>, vector<8x128xf32>
    %282 = arith.truncf %262 : vector<8x32xf32> to vector<8x32xbf16>
    %cst_75 = arith.constant dense<0.000000e+00> : vector<8x128xf32>
    %283 = tpu.matmul %282, %11, %cst_75 {dimension_numbers = #tpu.dot_dimension_numbers<[1], [0], [0], [1], [0, 0, 1, 1], [], []>} : vector<8x32xbf16>, vector<32x128xbf16>, vector<8x128xf32> -> vector<8x128xf32>
    %284 = arith.addf %281, %283 : vector<8x128xf32>
    %285 = vector.extract_strided_slice %284 {offsets = [0, 0], sizes = [8, 32], strides = [1, 1]} : vector<8x128xf32> to vector<8x32xf32>
    %286 = arith.negf %285 : vector<8x32xf32>
    %287 = math.exp %286 : vector<8x32xf32>
    %cst_76 = arith.constant 1.000000e+00 : f32
    %288 = vector.broadcast %cst_76 : f32 to vector<8x32xf32>
    %289 = arith.addf %288, %287 : vector<8x32xf32>
    %290 = arith.divf %288, %289 : vector<8x32xf32>
    %291 = vector.extract_strided_slice %284 {offsets = [0, 32], sizes = [8, 32], strides = [1, 1]} : vector<8x128xf32> to vector<8x32xf32>
    %292 = arith.negf %291 : vector<8x32xf32>
    %293 = math.exp %292 : vector<8x32xf32>
    %cst_77 = arith.constant 1.000000e+00 : f32
    %294 = vector.broadcast %cst_77 : f32 to vector<8x32xf32>
    %295 = arith.addf %294, %293 : vector<8x32xf32>
    %296 = arith.divf %294, %295 : vector<8x32xf32>
    %297 = vector.extract_strided_slice %284 {offsets = [0, 64], sizes = [8, 32], strides = [1, 1]} : vector<8x128xf32> to vector<8x32xf32>
    %298 = math.tanh %297 : vector<8x32xf32>
    %299 = vector.extract_strided_slice %284 {offsets = [0, 96], sizes = [8, 32], strides = [1, 1]} : vector<8x128xf32> to vector<8x32xf32>
    %300 = arith.negf %299 : vector<8x32xf32>
    %301 = math.exp %300 : vector<8x32xf32>
    %cst_78 = arith.constant 1.000000e+00 : f32
    %302 = vector.broadcast %cst_78 : f32 to vector<8x32xf32>
    %303 = arith.addf %302, %301 : vector<8x32xf32>
    %304 = arith.divf %302, %303 : vector<8x32xf32>
    %305 = arith.mulf %296, %265 : vector<8x32xf32>
    %306 = arith.mulf %290, %298 : vector<8x32xf32>
    %307 = arith.addf %305, %306 : vector<8x32xf32>
    %308 = math.tanh %307 : vector<8x32xf32>
    %309 = arith.mulf %304, %308 : vector<8x32xf32>
    %310 = vector.broadcast %277 : i32 to vector<8x1xi32>
    %311 = arith.cmpi slt, %310, %12 : vector<8x1xi32>
    %312 = vector.shape_cast %311 : vector<8x1xi1> to vector<8x1xi1>
    %313 = vector.broadcast %312 : vector<8x1xi1> to vector<8x32xi1>
    %314 = arith.select %313, %309, %262 : vector<8x32xi1>, vector<8x32xf32>
    %315 = vector.shape_cast %311 : vector<8x1xi1> to vector<8x1xi1>
    %316 = vector.broadcast %315 : vector<8x1xi1> to vector<8x32xi1>
    %317 = arith.select %316, %307, %265 : vector<8x32xi1>, vector<8x32xf32>
    %cst_79 = arith.constant 0.000000e+00 : f32
    %318 = vector.shape_cast %311 : vector<8x1xi1> to vector<8x1xi1>
    %319 = vector.broadcast %318 : vector<8x1xi1> to vector<8x32xi1>
    %320 = vector.broadcast %cst_79 : f32 to vector<8x32xf32>
    %321 = arith.select %319, %314, %320 : vector<8x32xi1>, vector<8x32xf32>
    %322 = arith.truncf %321 : vector<8x32xf32> to vector<8x32xbf16>
    %c0_80 = arith.constant 0 : index
    %323 = arith.index_cast %279 : i32 to index
    %c0_81 = arith.constant 0 : index
    %324 = vector.load %arg6[%c0_80, %323, %c0_81] : memref<1x64x32xbf16, #tpu.memory_space<vmem>>, vector<1x8x32xbf16>
    %325 = vector.shape_cast %324 : vector<1x8x32xbf16> to vector<8x32xbf16>
    %326 = vector.shape_cast %322 : vector<8x32xbf16> to vector<1x8x32xbf16>
    tpu.vector_store %arg6[%c0_80, %323, %c0_81], %326 {strides = array<i32>} : memref<1x64x32xbf16, #tpu.memory_space<vmem>>, vector<1x8x32xbf16>,
    %c6_i32 = arith.constant 6 : i32
    %c0_i32_82 = arith.constant 0 : i32
    %327 = arith.cmpi eq, %arg0, %c0_i32_82 : i32
    %c7_i32_83 = arith.constant 7 : i32
    %328 = arith.subi %c7_i32_83, %c6_i32 : i32
    %329 = arith.select %327, %c6_i32, %328 : i32
    %c8_i32_84 = arith.constant 8 : i32
    %330 = arith.muli %329, %c8_i32_84 : i32
    %331 = tpu.assume_multiple %330, 8 : i32
    %332 = arith.index_cast %331 : i32 to index
    %c0_85 = arith.constant 0 : index
    %333 = vector.load %arg8[%332, %c0_85] : memref<64x128xf32, #tpu.memory_space<vmem>>, vector<8x128xf32>
    %334 = arith.truncf %314 : vector<8x32xf32> to vector<8x32xbf16>
    %cst_86 = arith.constant dense<0.000000e+00> : vector<8x128xf32>
    %335 = tpu.matmul %334, %11, %cst_86 {dimension_numbers = #tpu.dot_dimension_numbers<[1], [0], [0], [1], [0, 0, 1, 1], [], []>} : vector<8x32xbf16>, vector<32x128xbf16>, vector<8x128xf32> -> vector<8x128xf32>
    %336 = arith.addf %333, %335 : vector<8x128xf32>
    %337 = vector.extract_strided_slice %336 {offsets = [0, 0], sizes = [8, 32], strides = [1, 1]} : vector<8x128xf32> to vector<8x32xf32>
    %338 = arith.negf %337 : vector<8x32xf32>
    %339 = math.exp %338 : vector<8x32xf32>
    %cst_87 = arith.constant 1.000000e+00 : f32
    %340 = vector.broadcast %cst_87 : f32 to vector<8x32xf32>
    %341 = arith.addf %340, %339 : vector<8x32xf32>
    %342 = arith.divf %340, %341 : vector<8x32xf32>
    %343 = vector.extract_strided_slice %336 {offsets = [0, 32], sizes = [8, 32], strides = [1, 1]} : vector<8x128xf32> to vector<8x32xf32>
    %344 = arith.negf %343 : vector<8x32xf32>
    %345 = math.exp %344 : vector<8x32xf32>
    %cst_88 = arith.constant 1.000000e+00 : f32
    %346 = vector.broadcast %cst_88 : f32 to vector<8x32xf32>
    %347 = arith.addf %346, %345 : vector<8x32xf32>
    %348 = arith.divf %346, %347 : vector<8x32xf32>
    %349 = vector.extract_strided_slice %336 {offsets = [0, 64], sizes = [8, 32], strides = [1, 1]} : vector<8x128xf32> to vector<8x32xf32>
    %350 = math.tanh %349 : vector<8x32xf32>
    %351 = vector.extract_strided_slice %336 {offsets = [0, 96], sizes = [8, 32], strides = [1, 1]} : vector<8x128xf32> to vector<8x32xf32>
    %352 = arith.negf %351 : vector<8x32xf32>
    %353 = math.exp %352 : vector<8x32xf32>
    %cst_89 = arith.constant 1.000000e+00 : f32
    %354 = vector.broadcast %cst_89 : f32 to vector<8x32xf32>
    %355 = arith.addf %354, %353 : vector<8x32xf32>
    %356 = arith.divf %354, %355 : vector<8x32xf32>
    %357 = arith.mulf %348, %317 : vector<8x32xf32>
    %358 = arith.mulf %342, %350 : vector<8x32xf32>
    %359 = arith.addf %357, %358 : vector<8x32xf32>
    %360 = math.tanh %359 : vector<8x32xf32>
    %361 = arith.mulf %356, %360 : vector<8x32xf32>
    %362 = vector.broadcast %329 : i32 to vector<8x1xi32>
    %363 = arith.cmpi slt, %362, %12 : vector<8x1xi32>
    %364 = vector.shape_cast %363 : vector<8x1xi1> to vector<8x1xi1>
    %365 = vector.broadcast %364 : vector<8x1xi1> to vector<8x32xi1>
    %366 = arith.select %365, %361, %314 : vector<8x32xi1>, vector<8x32xf32>
    %367 = vector.shape_cast %363 : vector<8x1xi1> to vector<8x1xi1>
    %368 = vector.broadcast %367 : vector<8x1xi1> to vector<8x32xi1>
    %369 = arith.select %368, %359, %317 : vector<8x32xi1>, vector<8x32xf32>
    %cst_90 = arith.constant 0.000000e+00 : f32
    %370 = vector.shape_cast %363 : vector<8x1xi1> to vector<8x1xi1>
    %371 = vector.broadcast %370 : vector<8x1xi1> to vector<8x32xi1>
    %372 = vector.broadcast %cst_90 : f32 to vector<8x32xf32>
    %373 = arith.select %371, %366, %372 : vector<8x32xi1>, vector<8x32xf32>
    %374 = arith.truncf %373 : vector<8x32xf32> to vector<8x32xbf16>
    %c0_91 = arith.constant 0 : index
    %375 = arith.index_cast %331 : i32 to index
    %c0_92 = arith.constant 0 : index
    %376 = vector.load %arg6[%c0_91, %375, %c0_92] : memref<1x64x32xbf16, #tpu.memory_space<vmem>>, vector<1x8x32xbf16>
    %377 = vector.shape_cast %376 : vector<1x8x32xbf16> to vector<8x32xbf16>
    %378 = vector.shape_cast %374 : vector<8x32xbf16> to vector<1x8x32xbf16>
    tpu.vector_store %arg6[%c0_91, %375, %c0_92], %378 {strides = array<i32>} : memref<1x64x32xbf16, #tpu.memory_space<vmem>>, vector<1x8x32xbf16>,
    %c7_i32_93 = arith.constant 7 : i32
    %c0_i32_94 = arith.constant 0 : i32
    %379 = arith.cmpi eq, %arg0, %c0_i32_94 : i32
    %c7_i32_95 = arith.constant 7 : i32
    %380 = arith.subi %c7_i32_95, %c7_i32_93 : i32
    %381 = arith.select %379, %c7_i32_93, %380 : i32
    %c8_i32_96 = arith.constant 8 : i32
    %382 = arith.muli %381, %c8_i32_96 : i32
    %383 = tpu.assume_multiple %382, 8 : i32
    %384 = arith.index_cast %383 : i32 to index
    %c0_97 = arith.constant 0 : index
    %385 = vector.load %arg8[%384, %c0_97] : memref<64x128xf32, #tpu.memory_space<vmem>>, vector<8x128xf32>
    %386 = arith.truncf %366 : vector<8x32xf32> to vector<8x32xbf16>
    %cst_98 = arith.constant dense<0.000000e+00> : vector<8x128xf32>
    %387 = tpu.matmul %386, %11, %cst_98 {dimension_numbers = #tpu.dot_dimension_numbers<[1], [0], [0], [1], [0, 0, 1, 1], [], []>} : vector<8x32xbf16>, vector<32x128xbf16>, vector<8x128xf32> -> vector<8x128xf32>
    %388 = arith.addf %385, %387 : vector<8x128xf32>
    %389 = vector.extract_strided_slice %388 {offsets = [0, 0], sizes = [8, 32], strides = [1, 1]} : vector<8x128xf32> to vector<8x32xf32>
    %390 = arith.negf %389 : vector<8x32xf32>
    %391 = math.exp %390 : vector<8x32xf32>
    %cst_99 = arith.constant 1.000000e+00 : f32
    %392 = vector.broadcast %cst_99 : f32 to vector<8x32xf32>
    %393 = arith.addf %392, %391 : vector<8x32xf32>
    %394 = arith.divf %392, %393 : vector<8x32xf32>
    %395 = vector.extract_strided_slice %388 {offsets = [0, 32], sizes = [8, 32], strides = [1, 1]} : vector<8x128xf32> to vector<8x32xf32>
    %396 = arith.negf %395 : vector<8x32xf32>
    %397 = math.exp %396 : vector<8x32xf32>
    %cst_100 = arith.constant 1.000000e+00 : f32
    %398 = vector.broadcast %cst_100 : f32 to vector<8x32xf32>
    %399 = arith.addf %398, %397 : vector<8x32xf32>
    %400 = arith.divf %398, %399 : vector<8x32xf32>
    %401 = vector.extract_strided_slice %388 {offsets = [0, 64], sizes = [8, 32], strides = [1, 1]} : vector<8x128xf32> to vector<8x32xf32>
    %402 = math.tanh %401 : vector<8x32xf32>
    %403 = vector.extract_strided_slice %388 {offsets = [0, 96], sizes = [8, 32], strides = [1, 1]} : vector<8x128xf32> to vector<8x32xf32>
    %404 = arith.negf %403 : vector<8x32xf32>
    %405 = math.exp %404 : vector<8x32xf32>
    %cst_101 = arith.constant 1.000000e+00 : f32
    %406 = vector.broadcast %cst_101 : f32 to vector<8x32xf32>
    %407 = arith.addf %406, %405 : vector<8x32xf32>
    %408 = arith.divf %406, %407 : vector<8x32xf32>
    %409 = arith.mulf %400, %369 : vector<8x32xf32>
    %410 = arith.mulf %394, %402 : vector<8x32xf32>
    %411 = arith.addf %409, %410 : vector<8x32xf32>
    %412 = math.tanh %411 : vector<8x32xf32>
    %413 = arith.mulf %408, %412 : vector<8x32xf32>
    %414 = vector.broadcast %381 : i32 to vector<8x1xi32>
    %415 = arith.cmpi slt, %414, %12 : vector<8x1xi32>
    %416 = vector.shape_cast %415 : vector<8x1xi1> to vector<8x1xi1>
    %417 = vector.broadcast %416 : vector<8x1xi1> to vector<8x32xi1>
    %418 = arith.select %417, %413, %366 : vector<8x32xi1>, vector<8x32xf32>
    %419 = vector.shape_cast %415 : vector<8x1xi1> to vector<8x1xi1>
    %420 = vector.broadcast %419 : vector<8x1xi1> to vector<8x32xi1>
    %421 = arith.select %420, %411, %369 : vector<8x32xi1>, vector<8x32xf32>
    %cst_102 = arith.constant 0.000000e+00 : f32
    %422 = vector.shape_cast %415 : vector<8x1xi1> to vector<8x1xi1>
    %423 = vector.broadcast %422 : vector<8x1xi1> to vector<8x32xi1>
    %424 = vector.broadcast %cst_102 : f32 to vector<8x32xf32>
    %425 = arith.select %423, %418, %424 : vector<8x32xi1>, vector<8x32xf32>
    %426 = arith.truncf %425 : vector<8x32xf32> to vector<8x32xbf16>
    %c0_103 = arith.constant 0 : index
    %427 = arith.index_cast %383 : i32 to index
    %c0_104 = arith.constant 0 : index
    %428 = vector.load %arg6[%c0_103, %427, %c0_104] : memref<1x64x32xbf16, #tpu.memory_space<vmem>>, vector<1x8x32xbf16>
    %429 = vector.shape_cast %428 : vector<1x8x32xbf16> to vector<8x32xbf16>
    %430 = vector.shape_cast %426 : vector<8x32xbf16> to vector<1x8x32xbf16>
    tpu.vector_store %arg6[%c0_103, %427, %c0_104], %430 {strides = array<i32>} : memref<1x64x32xbf16, #tpu.memory_space<vmem>>, vector<1x8x32xbf16>,
    %c8_i32_105 = arith.constant 8 : i32
    %c0_106 = arith.constant 0 : index
    %c0_107 = arith.constant 0 : index
    %c0_108 = arith.constant 0 : index
    %431 = vector.load %arg7[%c0_106, %c0_107, %c0_108] : memref<1x8x32xf32, #tpu.memory_space<vmem>>, vector<1x8x32xf32>
    %432 = vector.shape_cast %431 : vector<1x8x32xf32> to vector<8x32xf32>
    %433 = vector.shape_cast %418 : vector<8x32xf32> to vector<1x8x32xf32>
    tpu.vector_store %arg7[%c0_106, %c0_107, %c0_108], %433 {strides = array<i32>} : memref<1x8x32xf32, #tpu.memory_space<vmem>>, vector<1x8x32xf32>,
    return
  }
  func.func @transform_0(%arg0: i32) -> (i32, i32) {
    %c0_i32 = arith.constant 0 : i32
    %c0_i32_0 = arith.constant 0 : i32
    %c0_i32_1 = arith.constant 0 : i32
    return %c0_i32, %c0_i32_0 : i32, i32
  }
  func.func @transform_1(%arg0: i32) -> (i32, i32, i32) {
    %c0_i32 = arith.constant 0 : i32
    %c0_i32_0 = arith.constant 0 : i32
    %c0_i32_1 = arith.constant 0 : i32
    %c0_i32_2 = arith.constant 0 : i32
    return %c0_i32, %c0_i32_0, %c0_i32_1 : i32, i32, i32
  }
  func.func @transform_2(%arg0: i32) -> (i32, i32, i32, i32) {
    %c0_i32 = arith.constant 0 : i32
    %c0_i32_0 = arith.constant 0 : i32
    %c0_i32_1 = arith.constant 0 : i32
    %c0_i32_2 = arith.constant 0 : i32
    return %arg0, %c0_i32, %c0_i32_0, %c0_i32_1 : i32, i32, i32, i32
  }
  func.func @transform_3(%arg0: i32) -> (i32, i32, i32) {
    %c0_i32 = arith.constant 0 : i32
    %c0_i32_0 = arith.constant 0 : i32
    %c0_i32_1 = arith.constant 0 : i32
    return %arg0, %c0_i32, %c0_i32_0 : i32, i32, i32
  }
  func.func @transform_4(%arg0: i32) -> (i32, i32, i32) {
    %c0_i32 = arith.constant 0 : i32
    %c0_i32_0 = arith.constant 0 : i32
    %c0_i32_1 = arith.constant 0 : i32
    return %arg0, %c0_i32, %c0_i32_0 : i32, i32, i32
  }
  func.func @transform_5(%arg0: i32) -> (i32, i32, i32) {
    %c0_i32 = arith.constant 0 : i32
    %c0_i32_0 = arith.constant 0 : i32
    %c0_i32_1 = arith.constant 0 : i32
    return %arg0, %c0_i32, %c0_i32_0 : i32, i32, i32
  }
  func.func @transform_6(%arg0: i32) -> (i32, i32, i32) {
    %c0_i32 = arith.constant 0 : i32
    %c0_i32_0 = arith.constant 0 : i32
    %c0_i32_1 = arith.constant 0 : i32
    return %arg0, %c0_i32, %c0_i32_0 : i32, i32, i32
  }
}

</mosaic_0001>

<bundles_post_ra>
// kernel: tpu_custom_call.1
= control target key start
LH: loop header
LB: loop body
LE: loop exit
PB: predicated region body
PF: predicated region fallthrough
CT: control target
= control target key end

     0   :  { %s2244_s0 = inlined_call_operand.vmem [shape: s32[8,1], index: 0, kind: input, shape index: {}]   ;;  %s2245_s1 = inlined_call_operand.vmem [shape: bf16[1,64,32], index: 1, kind: input, shape index: {}]   ;;  %s2246_s2 = inlined_call_operand.vmem [shape: bf16[2,1,32,128], index: 2, kind: input, shape index: {}]   ;;  %s2247_s3 = inlined_call_operand.vmem [shape: bf16[2,32,128], index: 3, kind: input, shape index: {}]   ;;  %s2248_s4 = inlined_call_operand.vmem [shape: f32[2,1,128], index: 4, kind: input, shape index: {}]   ;;  %s2249_s5 = inlined_call_operand.vmem [shape: bf16[2,64,32], index: 5, kind: output, shape index: {0}]   ;;  %s2250_s6 = inlined_call_operand.hbm [shape: f32[2,8,32], index: 6, kind: output, shape index: {1}]  }
   0x1   :  { %2261 = sst [smem:[#allocation6_spill]] %s2244_s0 }
   0x2   :  { %2262 = sst [smem:[#allocation7_spill]] %s2245_s1 }
   0x3   :  { %2263 = sst [smem:[#allocation8_spill]] %s2246_s2 }
   0x4   :  { %2264 = sst [smem:[#allocation9_spill]] %s2247_s3 }
   0x5   :  { %2265 = sst [smem:[#allocation10_spill]] %s2248_s4 }
   0x6   :  { %12 = vsyncpa [#allocation4], 0 }
   0x7   :  { %14 = vsyncpa [#allocation4 + $0x1], 0  ;;  %s1809_s21 = smov 0   ;;  %s1811_s22 = smov 0  }
   0x8   :  { %s1813_s23 = smov 0   ;;  %s1815_s24 = smov 0  }
   0x9 LB: > { %s1830_s25 = sadd.s32 4294967295, %s1766_s24   ;;  %s1402_s26 = sadd.s32 4294967294, %s1766_s24   ;;  %s1766_s24 = sphi %s1815_s24, %s2285_s24   ;;  %s1762_s23 = sphi %s1813_s23, %s2284_s23   ;;  %s1758_s22 = sphi %s1811_s22, %s2283_s22   ;;  %s1754_s21 = sphi %s1809_s21, %s2282_s21  }
   0xa   : > { %s1834_s27 = sadd.s32 1, %s1766_s24   ;;  %s173_s28 = sadd.s32 1, %s1762_s23 }
   0xb   : > { %s170_s29 = ssub.s32 %s1766_s24, %s1834_s27  ;;  %p183_p0 = scmp.ne.s32.totalorder %s1762_s23, %s1758_s22 }
   0xc   : > { %p171_p1 = scmp.eq.s32.totalorder %s170_s29, 0  ;;  %p184_p2 = scmp.eq.s32.totalorder %s1830_s25, 1 }
   0xd   : > { %p189_p3 = scmp.ne.s32.totalorder %s1758_s22, %s1754_s21  ;;  %p190_p4 = scmp.eq.s32.totalorder %s1402_s26, 1 }
   0xe   : > { %s1845_s30 = scalar_select %p171_p1, %s1762_s23, %s173_s28  }
   0xf   : > { %p1847_p5 = por %p184_p2, %p183_p0  ;;  %p1851_p6 = por %p190_p4, %p189_p3 }
  0x10   : > { %p1405_p7 = scmp.ge.s32.totalorder %s1766_s24, 1  ;;  %p236_p8 = scmp.lt.s32.totalorder %s1766_s24, 3 }
  0x12   : > { %p237_p9 = pnand %p1405_p7, %p236_p8 }
  0x13   : > { %p279_p10 = scmp.lt.s32.totalorder (!%p237_p9), %s1830_s25, 1  ;;  %s2268_s1 = sld [smem:[#allocation7_spill]] (!%p237_p9)  ;;  %vm343_vm0 = vcmask (!%p237_p9), 261120   ;;  %v1768_v1 = vmov (!%p237_p9), 0.0   ;;  %vm1769_vm1 = vmmov (!%p237_p9), 0   ;;  %v1770_v2 = vmov (!%p237_p9), 0  }
  0x14   : > { %240 = sbr.rel (%p237_p9) target bundleno = 5714 (0x1652), region = 40  ;;  %1522 = vmatprep.subr.bf16.mxu1 (!%p237_p9), %v1768_v1  ;;  %s2269_s2 = sld [smem:[#allocation8_spill]] (!%p237_p9)  ;;  %1526 = vmatprep.mubr.msk.bf16.mxu1 (!%p237_p9), %vm1769_vm1, %v1768_v1 }
  0x15   : > { %s2270_s3 = sld [smem:[#allocation9_spill]] (!%p237_p9)  ;;  %1630 = vset.pattern.permute.xlu1 (!%p237_p9), %v1770_v2  ;;  %1631 = vset.pattern.permute.xlu0 (!%p237_p9), %v1770_v2  ;;  %p448_p11 = scmp.eq.s32.totalorder (!%p237_p9), %s1830_s25, 0 }
  0x16   : > { %s2271_s0 = sld [smem:[#allocation6_spill]] (!%p237_p9)  ;;  %s2272_s4 = sld [smem:[#allocation10_spill]] (!%p237_p9) }
  0x17   : > { %s2258_s19 = smov (!%p237_p9), 64   ;;  %s2259_s20 = smov (!%p237_p9), 32  }
  0x19   : > { %v1636_v0 = vld [vmem:[%s2268_s1] sm:$0xff] (!%p237_p9)   ;;  %v1637_v7 = vld [vmem:[%s2268_s1 + $0x8] sm:$0xff] (!%p237_p9)   ;;  %v1638_v8 = vld [vmem:[%s2268_s1 + $0x10] sm:$0xff] (!%p237_p9)  }
  0x1a   : > { %1514 = vmatprep.mubr.msk.bf16.mxu0 (!%p237_p9), %vm343_vm0, %v1636_v0  ;;  %v1639_v9 = vld [vmem:[%s2268_s1 + $0x18] sm:$0xff] (!%p237_p9)  }
  0x1b   : > { %s1862_s11 = scalar_select %p279_p10, %s1830_s25, 1 }
  0x1c   : > { %s1914_s10 = scalar_select %p448_p11, 0, 7  ;;  %v1919_v10 = vld [vmem:[%s2271_s0] sm:$0xff] }
  0x1d   : > { %s1469_s12 = sshll.u32 %s1862_s11, 4  ;;  %s291_s16 = scalar_lea.vmem %s2272_s4, %s1862_s11 }
  0x1e   : > { %s283_s15 = scalar_lea.vmem %s2269_s2, %s1469_s12  ;;  %s288_s18 = scalar_lea.vmem %s2270_s3, %s1469_s12  ;;  %v533_v11 = vstv %s1914_s10  ;;  %v1423_v13 = vld [vmem:[%s291_s16] ss:$0 sm:$0xff] }
  0x1f   : > { %v1632_v3 = vld [vmem:[%s283_s15] sm:$0xff]   ;;  %v1635_v5 = vld [vmem:[%s283_s15 + $0x8] sm:$0xff]   ;;  %vm534_vm2 = vcmp.lt.s32.totalorder %v533_v11, %v1919_v10  ;;  %s1424_s17 = sshll.u32 %s1914_s10, 3 }
  0x20   : > { %1510 = vmatprep.subr.bf16.mxu0 %v1632_v3  ;;  %v1877_v4 = vld [vmem:[%s288_s18] sm:$0xff]   ;;  %v1879_v6 = vld [vmem:[%s288_s18 + $0x8] sm:$0xff]   ;;  %v535_v12 = vsel %vm534_vm2, 1, %v1770_v2  ;;  %s451_s18 = scalar_lea.vmem [#allocation2], %s1424_s17  ;;  %vm553_vm2 = vcmask 257024  }
  0x21   : > { %1511 = vmatpush3.bf16.msra.mxu0 %v1632_v3  ;;  %1523 = vmatpush3.bf16.msra.mxu1 %v1877_v4  ;;  %s1948_s26 = scalar_select %p448_p11, 1, 6 }
  0x22   : > { %1512 = vmatprep.subr.bf16.mxu0 %v1635_v5  ;;  %1524 = vmatprep.subr.bf16.mxu1 %v1768_v1  ;;  %s1978_s9 = scalar_select %p448_p11, 2, 5 }
  0x23   : > { %537 = vperm.xlu1 %1630, %v535_v12   ;;  %s2257_s28 = sshll.u32 %s1948_s26, 3  ;;  %v629_v59 = vstv %s1948_s26 }
  0x24   : > { %s557_s29 = scalar_lea.vmem [#allocation2], %s2257_s28  ;;  %vm630_vm4 = vcmp.lt.s32.totalorder %v629_v59, %v1919_v10  ;;  %s2255_s12 = sshll.u32 %s1978_s9, 3 }
  0x25   : > { %1513 = vmatpush3.bf16.msra.mxu0 %v1635_v5  ;;  %1525 = vmatpush3.bf16.msra.mxu1 %v1879_v6  ;;  %v631_v61 = vsel %vm630_vm4, 1, %v1770_v2  ;;  %s653_s13 = scalar_lea.vmem [#allocation2], %s2255_s12  ;;  %s2275_s10 = sshll.u32 %s1978_s9, 3 }
  0x26   : > { %1538 = vmatprep.subr.bf16.mxu0 %v1768_v1  ;;  %1530 = vmatprep.subr.bf16.mxu1 %v1768_v1  ;;  %s2009_s14 = scalar_select %p448_p11, 3, 4 }
  0x28   : > { %1515 = vmatmul.mubr.msk.bf16.vlgmr.msra.gmra.mrb[0].mxu0 %vm343_vm0, %v1637_v7  ;;  %1527 = vmatmul.mubr.bf16.vlgmr.msra.gmra.mrb[0].mxu1 %v1770_v2  ;;  %s2253_s15 = sshll.u32 %s2009_s14, 3 }
  0x29   : > { %1518 = vmatprep.mubr.msk.bf16.mxu0 %vm343_vm0, %v1638_v8  ;;  %1531 = vmatpush3.bf16.msra.mxu1 %v1877_v4  ;;  %s751_s16 = scalar_lea.vmem [#allocation2], %s2253_s15 }
  0x2a   : > { %1534 = vmatprep.mubr.msk.bf16.mxu1 %vm1769_vm1, %v1768_v1  ;;  %1532 = vmatprep.subr.bf16.mxu1 %v1768_v1 }
  0x2b   : > { %1539 = vmatpush3.bf16.msra.mxu0 %v1877_v4 }
  0x2c   : > { %1540 = vmatprep.subr.bf16.mxu0 %v1768_v1 }
  0x2d   : > { %1533 = vmatpush3.bf16.msra.mxu1 %v1879_v6 }
  0x2e   : > { %1546 = vmatprep.subr.bf16.mxu1 %v1768_v1 }
  0x2f   : > { %1541 = vmatpush3.bf16.msra.mxu0 %v1879_v6 }
  0x30   : > { %1519 = vmatmul.mubr.msk.bf16.gmra.mrb[4].mxu0 %vm343_vm0, %v1639_v9  ;;  %1554 = vmatprep.subr.bf16.mxu0 %v1768_v1 }
  0x31   : > { %1542 = vmatprep.mubr.msk.bf16.mxu0 %vm1769_vm1, %v1768_v1 }
  0xa2   : > { %v538_v47 = vpop.permute.xlu1 %537 }
  0xa3   : > { %vm539_vm3 = vcmp.eq.s32.totalorder %v538_v47, 1 }
  0xfb   : > { %v1516_v14 = vpop.f32.mrb[0].mxu0  ;;  %v502_v17 = vpop.f32.mrb[0].mxu1 }
  0xfc   : > { %v429_v15 = vadd.f32 %v1516_v14, %v1423_v13  ;;  %v390_v16 = vpop.f32.mrb[1].mxu0  ;;  %v1528_v20 = vpop.f32.mrb[1].mxu1 }
  0xfd   : > { %v427_v18 = vadd.f32 %v1423_v13, %v390_v16  ;;  %v1517_v19 = vpop.f32.mrb[2].mxu0  ;;  %v505_v23 = vpop.f32.mrb[2].mxu1 }
  0xfe   : > { %437 = vst [vmem:[#allocation2 + $0x10] sm:$0xff] %v429_v15  ;;  %v430_v21 = vadd.f32 %v1517_v19, %v1423_v13  ;;  %v393_v22 = vpop.f32.mrb[3].mxu0  ;;  %v1529_v25 = vpop.f32.mrb[3].mxu1 }
  0xff   : > { %435 = vst [vmem:[#allocation2] sm:$0xff] %v427_v18  ;;  %v428_v24 = vadd.f32 %v1423_v13, %v393_v22 }
 0x100   : > { %438 = vst [vmem:[#allocation2 + $0x18] sm:$0xff] %v430_v21 }
 0x101   : > { %436 = vst [vmem:[#allocation2 + $0x8] sm:$0xff] %v428_v24 }
 0x103   : > { %v1520_v26 = vpop.f32.mrb[4].mxu0 }
 0x104   : > { %v433_v27 = vadd.f32 %v1520_v26, %v1423_v13  ;;  %v406_v28 = vpop.f32.mrb[5].mxu0  ;;  %v727_v26 = vstv %s1978_s9 }
 0x105   : > { %v431_v29 = vadd.f32 %v1423_v13, %v406_v28  ;;  %v1521_v30 = vpop.f32.mrb[6].mxu0  ;;  %vm728_vm6 = vcmp.lt.s32.totalorder %v727_v26, %v1919_v10 }
 0x106   : > { %441 = vst [vmem:[#allocation2 + $0x30] sm:$0xff] %v433_v27  ;;  %v434_v31 = vadd.f32 %v1521_v30, %v1423_v13  ;;  %v409_v32 = vpop.f32.mrb[7].mxu0  ;;  %v729_v28 = vsel %vm728_vm6, 1, %v1770_v2 }
 0x107   : > { %439 = vst [vmem:[#allocation2 + $0x20] sm:$0xff] %v431_v29  ;;  %v432_v33 = vadd.f32 %v1423_v13, %v409_v32 }
 0x108   : > { %442 = vst [vmem:[#allocation2 + $0x38] sm:$0xff] %v434_v31 }
 0x109   : > { %440 = vst [vmem:[#allocation2 + $0x28] sm:$0xff] %v432_v33 }
 0x110   : > { %v452_v34 = vld [vmem:[%s451_s18] sm:$0xff]  ;;  %s2039_s18 = scalar_select %p448_p11, 4, 3 }
 0x111   : > { %v508_v35 = vadd.f32 %v502_v17, %v452_v34  ;;  %v558_v53 = vld [vmem:[%s557_s29] sm:$0xff] }
 0x112   : > { %v654_v20 = vld [vmem:[%s653_s13] sm:$0xff]  ;;  %s2251_s29 = sshll.u32 %s2039_s18, 3 }
 0x113   : > { %1640 = vtanh.f32 %v508_v35  ;;  %v1427_v37 = vmul.f32 -1.442695, %v508_v35  ;;  %s849_s13 = scalar_lea.vmem [#allocation2], %s2251_s29 }
 0x115   : > { %1642 = vpow2.f32 %v1427_v37 }
 0x11d   : > { %v1641_v36 = vpop.eup %1640 }
 0x11e   : > { %518 = vrot.lane.b32.xlu0 %v1641_v36, %s2258_s19 }
 0x11f   : > { %v1643_v38 = vpop.eup %1642 }
 0x120   : > { %v512_v39 = vadd.f32 1.0, %v1643_v38 }
 0x122   : > { %1644 = vrcp.f32 %v512_v39 }
 0x12c   : > { %v1645_v40 = vpop.eup %1644 }
 0x12d   : > { %v516_v43 = vmul.f32 0.0, %v1645_v40 }
 0x190   : > { %v519_v41 = vpop.permute.xlu0 %518 }
 0x191   : > { %v521_v42 = vmul.f32 %v1645_v40, %v519_v41 }
 0x193   : > { %523 = vrot.lane.b32.xlu0 %v521_v42, %s2259_s20 }
 0x205   : > { %v524_v44 = vpop.permute.xlu0 %523 }
 0x206   : > { %v526_v45 = vadd.f32 %v524_v44, %v516_v43 }
 0x208   : > { %1646 = vtanh.f32 %v526_v45  ;;  %v541_v8 = vsel %vm539_vm3, %v526_v45, 0.0 }
 0x212   : > { %v1647_v46 = vpop.eup %1646 }
 0x213   : > { %529 = vrot.lane.b32.xlu1 %v1647_v46, %s2258_s19  ;;  %v752_v46 = vld [vmem:[%s751_s16] sm:$0xff]  ;;  %s2069_s16 = scalar_select %p448_p11, 5, 2 }
 0x285   : > { %v530_v48 = vpop.permute.xlu1 %529 }
 0x286   : > { %v532_v49 = vmul.f32 %v1645_v40, %v530_v48 }
 0x288   : > { %v540_v50 = vsel %vm539_vm3, %v532_v49, 0.0 }
 0x289   : > { %v1935_v51 = vpack.c.bf16 %v540_v50, %v540_v50 }
 0x28b   : > { %559 = vrot.lane.b32.xlu0 %v1935_v51, %s2259_s20 }
 0x2fd   : > { %v560_v52 = vpop.permute.xlu0 %559 }
 0x2fe   : > { %1535 = vmatmul.mubr.msk.bf16.vlgmr.msra.gmra.mrb[4].mxu1 %vm343_vm0, %v560_v52 }
 0x2ff   : > { %1547 = vmatpush3.bf16.msra.mxu1 %v1877_v4  ;;  %1550 = vmatprep.mubr.msk.bf16.mxu1 %vm1769_vm1, %v1768_v1 }
 0x300   : > { %1548 = vmatprep.subr.bf16.mxu1 %v1768_v1 }
 0x303   : > { %1549 = vmatpush3.bf16.msra.mxu1 %v1879_v6 }
 0x304   : > { %1562 = vmatprep.subr.bf16.mxu1 %v1768_v1 }
 0x3d1   : > { %v598_v54 = vpop.f32.mrb[4].mxu1 }
 0x3d2   : > { %v604_v55 = vadd.f32 %v598_v54, %v558_v53  ;;  %v1536_v56 = vpop.f32.mrb[5].mxu1  ;;  %v825_v53 = vstv %s2009_s14 }
 0x3d3   : > { %v601_v57 = vpop.f32.mrb[6].mxu1  ;;  %vm826_vm8 = vcmp.lt.s32.totalorder %v825_v53, %v1919_v10 }
 0x3d4   : > { %1648 = vtanh.f32 %v604_v55  ;;  %v1537_v58 = vpop.f32.mrb[7].mxu1  ;;  %v1432_v62 = vmul.f32 -1.442695, %v604_v55  ;;  %v827_v55 = vsel %vm826_vm8, 1, %v1770_v2 }
 0x3d6   : > { %1650 = vpow2.f32 %v1432_v62 }
 0x3de   : > { %v1649_v60 = vpop.eup %1648 }
 0x3df   : > { %614 = vrot.lane.b32.xlu1 %v1649_v60, %s2258_s19 }
 0x3e0   : > { %v1651_v63 = vpop.eup %1650 }
 0x3e1   : > { %v608_v0 = vadd.f32 1.0, %v1651_v63 }
 0x3e3   : > { %633 = vperm.xlu1 %1630, %v631_v61   ;;  %1652 = vrcp.f32 %v608_v0 }
 0x3ed   : > { %v1653_v3 = vpop.eup %1652 }
 0x3ee   : > { %v612_v9 = vmul.f32 %v1653_v3, %v541_v8 }
 0x451   : > { %v615_v5 = vpop.permute.xlu1 %614 }
 0x452   : > { %v617_v7 = vmul.f32 %v1653_v3, %v615_v5 }
 0x454   : > { %619 = vrot.lane.b32.xlu0 %v617_v7, %s2259_s20 }
 0x462   : > { %v1960_v14 = vpop.permute.xlu1 %633 }
 0x463   : > { %vm635_vm5 = vcmp.eq.s32.totalorder %v1960_v14, 1 }
 0x4c6   : > { %v620_v11 = vpop.permute.xlu0 %619 }
 0x4c7   : > { %v622_v12 = vadd.f32 %v620_v11, %v612_v9 }
 0x4c9   : > { %1654 = vtanh.f32 %v622_v12  ;;  %v637_v35 = vsel %vm635_vm5, %v622_v12, %v541_v8 }
 0x4d3   : > { %v1655_v13 = vpop.eup %1654 }
 0x4d4   : > { %625 = vrot.lane.b32.xlu0 %v1655_v13, %s2258_s19 }
 0x546   : > { %v626_v15 = vpop.permute.xlu0 %625 }
 0x547   : > { %v1962_v16 = vmul.f32 %v1653_v3, %v626_v15  ;;  %v850_v15 = vld [vmem:[%s849_s13] sm:$0xff]  ;;  %s2252_s13 = sshll.u32 %s2069_s16, 3 }
 0x548   : > { %s947_s29 = scalar_lea.vmem [#allocation2], %s2252_s13 }
 0x549   : > { %v636_v17 = vsel %vm635_vm5, %v1962_v16, %v540_v50 }
 0x54a   : > { %v655_v18 = vpack.c.bf16 %v636_v17, %v636_v17 }
 0x54c   : > { %657 = vrot.lane.b32.xlu1 %v655_v18, %s2259_s20 }
 0x5be   : > { %v658_v19 = vpop.permute.xlu1 %657 }
 0x5bf   : > { %1543 = vmatmul.mubr.msk.bf16.vlgmr.msra.gmra.mrb[8].mxu0 %vm343_vm0, %v658_v19 }
 0x5c0   : > { %1555 = vmatpush3.bf16.msra.mxu0 %v1877_v4  ;;  %1558 = vmatprep.mubr.msk.bf16.mxu0 %vm1769_vm1, %v1768_v1 }
 0x5c1   : > { %1556 = vmatprep.subr.bf16.mxu0 %v1768_v1 }
 0x5c4   : > { %1557 = vmatpush3.bf16.msra.mxu0 %v1879_v6 }
 0x5c5   : > { %1570 = vmatprep.subr.bf16.mxu0 %v1768_v1 }
 0x692   : > { %v696_v21 = vpop.f32.mrb[8].mxu0 }
 0x693   : > { %v702_v22 = vadd.f32 %v696_v21, %v654_v20  ;;  %v1544_v23 = vpop.f32.mrb[9].mxu0 }
 0x694   : > { %v699_v24 = vpop.f32.mrb[10].mxu0 }
 0x695   : > { %1656 = vtanh.f32 %v702_v22  ;;  %v1545_v25 = vpop.f32.mrb[11].mxu0  ;;  %v1437_v29 = vmul.f32 -1.442695, %v702_v22  ;;  %v923_v22 = vstv %s2039_s18 }
 0x696   : > { %vm924_vm10 = vcmp.lt.s32.totalorder %v923_v22, %v1919_v10 }
 0x697   : > { %1658 = vpow2.f32 %v1437_v29  ;;  %v925_v24 = vsel %vm924_vm10, 1, %v1770_v2 }
 0x69f   : > { %v1657_v27 = vpop.eup %1656 }
 0x6a0   : > { %712 = vrot.lane.b32.xlu0 %v1657_v27, %s2258_s19 }
 0x6a1   : > { %v1659_v30 = vpop.eup %1658 }
 0x6a2   : > { %v706_v31 = vadd.f32 1.0, %v1659_v30 }
 0x6a4   : > { %731 = vperm.xlu0 %1631, %v729_v28   ;;  %1660 = vrcp.f32 %v706_v31 }
 0x6ae   : > { %v1661_v32 = vpop.eup %1660 }
 0x6af   : > { %v710_v36 = vmul.f32 %v1661_v32, %v637_v35 }
 0x712   : > { %v713_v33 = vpop.permute.xlu0 %712 }
 0x713   : > { %v715_v34 = vmul.f32 %v1661_v32, %v713_v33 }
 0x715   : > { %717 = vrot.lane.b32.xlu1 %v715_v34, %s2259_s20 }
 0x723   : > { %v1991_v40 = vpop.permute.xlu0 %731 }
 0x724   : > { %vm733_vm7 = vcmp.eq.s32.totalorder %v1991_v40, 1 }
 0x787   : > { %v718_v37 = vpop.permute.xlu1 %717 }
 0x788   : > { %v720_v38 = vadd.f32 %v718_v37, %v710_v36 }
 0x78a   : > { %1662 = vtanh.f32 %v720_v38  ;;  %v735_v62 = vsel %vm733_vm7, %v720_v38, %v637_v35 }
 0x794   : > { %v1663_v39 = vpop.eup %1662 }
 0x795   : > { %723 = vrot.lane.b32.xlu1 %v1663_v39, %s2258_s19 }
 0x807   : > { %v724_v41 = vpop.permute.xlu1 %723 }
 0x808   : > { %v1993_v42 = vmul.f32 %v1661_v32, %v724_v41 }
 0x80a   : > { %v734_v43 = vsel %vm733_vm7, %v1993_v42, %v636_v17 }
 0x80b   : > { %v753_v44 = vpack.c.bf16 %v734_v43, %v734_v43 }
 0x80d   : > { %755 = vrot.lane.b32.xlu1 %v753_v44, %s2259_s20  ;;  %v948_v44 = vld [vmem:[%s947_s29] sm:$0xff]  ;;  %s2094_s29 = scalar_select %p448_p11, 6, 1 }
 0x80f   : > { %s2254_s13 = sshll.u32 %s2094_s29, 3 }
 0x810   : > { %s1045_s15 = scalar_lea.vmem [#allocation2], %s2254_s13 }
 0x87f   : > { %v756_v45 = vpop.permute.xlu1 %755 }
 0x880   : > { %1551 = vmatmul.mubr.msk.bf16.vlgmr.msra.gmra.mrb[8].mxu1 %vm343_vm0, %v756_v45 }
 0x881   : > { %1563 = vmatpush3.bf16.msra.mxu1 %v1877_v4  ;;  %1566 = vmatprep.mubr.msk.bf16.mxu1 %vm1769_vm1, %v1768_v1 }
 0x882   : > { %1564 = vmatprep.subr.bf16.mxu1 %v1768_v1 }
 0x885   : > { %1565 = vmatpush3.bf16.msra.mxu1 %v1879_v6 }
 0x886   : > { %1578 = vmatprep.subr.bf16.mxu1 %v1768_v1 }
 0x953   : > { %v794_v47 = vpop.f32.mrb[8].mxu1 }
 0x954   : > { %v800_v48 = vadd.f32 %v794_v47, %v752_v46  ;;  %v1552_v49 = vpop.f32.mrb[9].mxu1 }
 0x955   : > { %v797_v50 = vpop.f32.mrb[10].mxu1  ;;  %v1021_v49 = vstv %s2069_s16 }
 0x956   : > { %1664 = vtanh.f32 %v800_v48  ;;  %v1553_v52 = vpop.f32.mrb[11].mxu1  ;;  %v1442_v56 = vmul.f32 -1.442695, %v800_v48  ;;  %vm1022_vm12 = vcmp.lt.s32.totalorder %v1021_v49, %v1919_v10 }
 0x958   : > { %1666 = vpow2.f32 %v1442_v56 }
 0x960   : > { %v1665_v54 = vpop.eup %1664 }
 0x961   : > { %810 = vrot.lane.b32.xlu0 %v1665_v54, %s2258_s19 }
 0x962   : > { %v1667_v57 = vpop.eup %1666 }
 0x963   : > { %v804_v58 = vadd.f32 1.0, %v1667_v57 }
 0x965   : > { %829 = vperm.xlu0 %1631, %v827_v55   ;;  %1668 = vrcp.f32 %v804_v58 }
 0x96f   : > { %v1669_v59 = vpop.eup %1668 }
 0x970   : > { %v808_v63 = vmul.f32 %v1669_v59, %v735_v62 }
 0x9d3   : > { %v811_v60 = vpop.permute.xlu0 %810 }
 0x9d4   : > { %v813_v61 = vmul.f32 %v1669_v59, %v811_v60 }
 0x9d6   : > { %815 = vrot.lane.b32.xlu1 %v813_v61, %s2259_s20 }
 0x9e4   : > { %v2022_v7 = vpop.permute.xlu0 %829 }
 0x9e5   : > { %vm831_vm9 = vcmp.eq.s32.totalorder %v2022_v7, 1 }
 0xa48   : > { %v816_v0 = vpop.permute.xlu1 %815 }
 0xa49   : > { %v818_v3 = vadd.f32 %v816_v0, %v808_v63 }
 0xa4b   : > { %1670 = vtanh.f32 %v818_v3  ;;  %v833_v31 = vsel %vm831_vm9, %v818_v3, %v735_v62 }
 0xa55   : > { %v1671_v5 = vpop.eup %1670 }
 0xa56   : > { %821 = vrot.lane.b32.xlu1 %v1671_v5, %s2258_s19 }
 0xac8   : > { %v822_v8 = vpop.permute.xlu1 %821 }
 0xac9   : > { %v2024_v9 = vmul.f32 %v1669_v59, %v822_v8 }
 0xacb   : > { %v832_v11 = vsel %vm831_vm9, %v2024_v9, %v734_v43 }
 0xacc   : > { %v851_v12 = vpack.c.bf16 %v832_v11, %v832_v11 }
 0xace   : > { %853 = vrot.lane.b32.xlu0 %v851_v12, %s2259_s20 }
 0xb40   : > { %v854_v13 = vpop.permute.xlu0 %853 }
 0xb41   : > { %1559 = vmatmul.mubr.msk.bf16.vlgmr.msra.gmra.mrb[12].mxu0 %vm343_vm0, %v854_v13 }
 0xb42   : > { %1571 = vmatpush3.bf16.msra.mxu0 %v1877_v4  ;;  %1574 = vmatprep.mubr.msk.bf16.mxu0 %vm1769_vm1, %v1768_v1 }
 0xb43   : > { %1572 = vmatprep.subr.bf16.mxu0 %v1768_v1 }
 0xb46   : > { %1573 = vmatpush3.bf16.msra.mxu0 %v1879_v6 }
 0xc14   : > { %v892_v17 = vpop.f32.mrb[12].mxu0 }
 0xc15   : > { %v898_v18 = vadd.f32 %v892_v17, %v850_v15  ;;  %v1560_v19 = vpop.f32.mrb[13].mxu0 }
 0xc16   : > { %v895_v20 = vpop.f32.mrb[14].mxu0  ;;  %v1119_v19 = vstv %s2094_s29 }
 0xc17   : > { %1672 = vtanh.f32 %v898_v18  ;;  %v1561_v21 = vpop.f32.mrb[15].mxu0  ;;  %v1447_v25 = vmul.f32 -1.442695, %v898_v18  ;;  %vm1120_vm14 = vcmp.lt.s32.totalorder %v1119_v19, %v1919_v10 }
 0xc18   : > { %v1121_v21 = vsel %vm1120_vm14, 1, %v1770_v2 }
 0xc19   : > { %1674 = vpow2.f32 %v1447_v25 }
 0xc21   : > { %v1673_v23 = vpop.eup %1672 }
 0xc22   : > { %908 = vrot.lane.b32.xlu1 %v1673_v23, %s2258_s19 }
 0xc23   : > { %v1675_v26 = vpop.eup %1674 }
 0xc24   : > { %v902_v27 = vadd.f32 1.0, %v1675_v26 }
 0xc26   : > { %927 = vperm.xlu1 %1630, %v925_v24   ;;  %1676 = vrcp.f32 %v902_v27 }
 0xc30   : > { %v1677_v28 = vpop.eup %1676 }
 0xc31   : > { %v906_v32 = vmul.f32 %v1677_v28, %v833_v31 }
 0xc94   : > { %v909_v29 = vpop.permute.xlu1 %908 }
 0xc95   : > { %v911_v30 = vmul.f32 %v1677_v28, %v909_v29 }
 0xc97   : > { %913 = vrot.lane.b32.xlu0 %v911_v30, %s2259_s20 }
 0xca5   : > { %v2052_v36 = vpop.permute.xlu1 %927 }
 0xca6   : > { %vm929_vm11 = vcmp.eq.s32.totalorder %v2052_v36, 1 }
 0xd09   : > { %v914_v33 = vpop.permute.xlu0 %913 }
 0xd0a   : > { %v916_v34 = vadd.f32 %v914_v33, %v906_v32 }
 0xd0c   : > { %1678 = vtanh.f32 %v916_v34  ;;  %v931_v57 = vsel %vm929_vm11, %v916_v34, %v833_v31 }
 0xd16   : > { %v1679_v35 = vpop.eup %1678 }
 0xd17   : > { %919 = vrot.lane.b32.xlu0 %v1679_v35, %s2258_s19 }
 0xd89   : > { %v920_v37 = vpop.permute.xlu0 %919 }
 0xd8a   : > { %v2054_v38 = vmul.f32 %v1677_v28, %v920_v37 }
 0xd8c   : > { %v930_v39 = vsel %vm929_vm11, %v2054_v38, %v832_v11  ;;  %v1046_v11 = vld [vmem:[%s1045_s15] sm:$0xff]  ;;  %s2116_s15 = scalar_select %p448_p11, 7, 0 }
 0xd8d   : > { %v949_v41 = vpack.c.bf16 %v930_v39, %v930_v39 }
 0xd8e   : > { %s2256_s13 = sshll.u32 %s2116_s15, 3 }
 0xd8f   : > { %951 = vrot.lane.b32.xlu1 %v949_v41, %s2259_s20  ;;  %s1143_s12 = scalar_lea.vmem [#allocation2], %s2256_s13  ;;  %s549_s13 = sshra.s32 %s1424_s17, 3 }
 0xd90   : > { %s1429_s1 = sshll.u32 %s549_s13, 2  ;;  %s744_s17 = sshra.s32 %s2275_s10, 3 }
 0xd91   : > { %s1439_s28 = sshll.u32 %s744_s17, 2  ;;  %s2276_s13 = sshll.u32 %s2009_s14, 3 }
 0xe01   : > { %v952_v43 = vpop.permute.xlu1 %951 }
 0xe02   : > { %1567 = vmatmul.mubr.msk.bf16.vlgmr.msra.gmra.mrb[12].mxu1 %vm343_vm0, %v952_v43  ;;  %v1144_v43 = vld [vmem:[%s1143_s12] sm:$0xff]  ;;  %s1471_s12 = sshll.u32 %s1862_s11, 5  ;;  %s2273_s11 = smov 64  }
 0xe03   : > { %1579 = vmatpush3.bf16.msra.mxu1 %v1877_v4  ;;  %1582 = vmatprep.mubr.msk.bf16.mxu1 %vm1769_vm1, %v1768_v1  ;;  %s2144_s0 = scalar_lea.vmem %s2249_s5, %s1471_s12  ;;  %s842_s12 = sshra.s32 %s2276_s13, 3 }
 0xe04   : > { %1580 = vmatprep.subr.bf16.mxu1 %v1768_v1  ;;  %s552_s2 = scalar_lea.vmem %s2144_s0, %s1429_s1  ;;  %s2274_s1 = sshll.u32 %s1948_s26, 3 }
 0xe05   : > { %s1444_s26 = sshll.u32 %s842_s12, 2  ;;  %s2281_s13 = sshll.u32 %s2116_s15, 3 }
 0xe06   : > { %s845_s17 = scalar_lea.vmem %s2144_s0, %s1444_s26  ;;  %s1233_s12 = sshra.s32 %s2281_s13, 3 }
 0xe07   : > { %1581 = vmatpush3.bf16.msra.mxu1 %v1879_v6  ;;  %v1023_v6 = vsel %vm1022_vm12, 1, %v1770_v2 }
 0xed5   : > { %v990_v45 = vpop.f32.mrb[12].mxu1 }
 0xed6   : > { %v996_v46 = vadd.f32 %v990_v45, %v948_v44  ;;  %v1568_v4 = vpop.f32.mrb[13].mxu1 }
 0xed7   : > { %v993_v47 = vpop.f32.mrb[14].mxu1 }
 0xed8   : > { %1680 = vtanh.f32 %v996_v46  ;;  %v1569_v48 = vpop.f32.mrb[15].mxu1  ;;  %v1452_v50 = vmul.f32 -1.442695, %v996_v46 }
 0xed9   : > { %v1217_v48 = vstv %s2116_s15 }
 0xeda   : > { %1682 = vpow2.f32 %v1452_v50  ;;  %vm1218_vm1 = vcmp.lt.s32.totalorder %v1217_v48, %v1919_v10 }
 0xee2   : > { %v1681_v1 = vpop.eup %1680 }
 0xee3   : > { %1006 = vrot.lane.b32.xlu0 %v1681_v1, %s2258_s19  ;;  %v1219_v1 = vsel %vm1218_vm1, 1, %v1770_v2 }
 0xee4   : > { %v1683_v52 = vpop.eup %1682 }
 0xee5   : > { %v1000_v53 = vadd.f32 1.0, %v1683_v52  ;;  %v932_v52 = vsel %vm929_vm11, %v2054_v38, 0.0 }
 0xee6   : > { %v1476_v10 = vpack.c.bf16 %v932_v52, %v932_v52 }
 0xee7   : > { %1025 = vperm.xlu0 %1631, %v1023_v6   ;;  %1684 = vrcp.f32 %v1000_v53  ;;  %v736_v6 = vsel %vm733_vm7, %v1993_v42, 0.0 }
 0xee8   : > { %v1474_v50 = vpack.c.bf16 %v736_v6, %v736_v6 }
 0xef1   : > { %v1685_v54 = vpop.eup %1684 }
 0xef2   : > { %v1004_v58 = vmul.f32 %v1685_v54, %v931_v57 }
 0xf55   : > { %v1007_v55 = vpop.permute.xlu0 %1006 }
 0xf56   : > { %v1009_v56 = vmul.f32 %v1685_v54, %v1007_v55 }
 0xf58   : > { %1011 = vrot.lane.b32.xlu1 %v1009_v56, %s2259_s20 }
 0xf66   : > { %v2082_v62 = vpop.permute.xlu0 %1025 }
 0xf67   : > { %vm1027_vm13 = vcmp.eq.s32.totalorder %v2082_v62, 1 }
 0xfca   : > { %v1012_v59 = vpop.permute.xlu1 %1011 }
 0xfcb   : > { %v1014_v60 = vadd.f32 %v1012_v59, %v1004_v58 }
 0xfcd   : > { %1686 = vtanh.f32 %v1014_v60  ;;  %v1029_v28 = vsel %vm1027_vm13, %v1014_v60, %v931_v57 }
 0xfd7   : > { %v1687_v61 = vpop.eup %1686 }
 0xfd8   : > { %1017 = vrot.lane.b32.xlu1 %v1687_v61, %s2258_s19 }
0x104a   : > { %v1018_v63 = vpop.permute.xlu1 %1017 }
0x104b   : > { %v2084_v0 = vmul.f32 %v1685_v54, %v1018_v63  ;;  %v638_v63 = vsel %vm635_vm5, %v1962_v16, 0.0 }
0x104d   : > { %v1028_v3 = vsel %vm1027_vm13, %v2084_v0, %v930_v39 }
0x104e   : > { %v1047_v5 = vpack.c.bf16 %v1028_v3, %v1028_v3 }
0x1050   : > { %1049 = vrot.lane.b32.xlu0 %v1047_v5, %s2259_s20  ;;  %v834_v5 = vsel %vm831_vm9, %v2024_v9, 0.0 }
0x10c2   : > { %v1050_v8 = vpop.permute.xlu0 %1049 }
0x10c3   : > { %1575 = vmatmul.mubr.msk.bf16.vlgmr.msra.gmra.mrb[16].mxu0 %vm343_vm0, %v1050_v8  ;;  %v1475_v8 = vpack.c.bf16 %v834_v5, %v834_v5 }
0x1196   : > { %v1088_v12 = vpop.f32.mrb[16].mxu0 }
0x1197   : > { %v1094_v13 = vadd.f32 %v1088_v12, %v1046_v11  ;;  %v1576_v15 = vpop.f32.mrb[17].mxu0  ;;  %v1030_v11 = vsel %vm1027_vm13, %v2084_v0, 0.0 }
0x1198   : > { %v1091_v17 = vpop.f32.mrb[18].mxu0  ;;  %v1477_v14 = vpack.c.bf16 %v1030_v11, %v1030_v11 }
0x1199   : > { %1688 = vtanh.f32 %v1094_v13  ;;  %v1577_v18 = vpop.f32.mrb[19].mxu0  ;;  %v1457_v22 = vmul.f32 -1.442695, %v1094_v13 }
0x119b   : > { %1690 = vpow2.f32 %v1457_v22 }
0x11a3   : > { %v1689_v20 = vpop.eup %1688 }
0x11a4   : > { %1104 = vrot.lane.b32.xlu1 %v1689_v20, %s2258_s19 }
0x11a5   : > { %v1691_v23 = vpop.eup %1690 }
0x11a6   : > { %v1098_v24 = vadd.f32 1.0, %v1691_v23 }
0x11a8   : > { %1123 = vperm.xlu1 %1630, %v1121_v21   ;;  %1692 = vrcp.f32 %v1098_v24 }
0x11b2   : > { %v1693_v25 = vpop.eup %1692 }
0x11b3   : > { %v1102_v29 = vmul.f32 %v1693_v25, %v1029_v28 }
0x1216   : > { %v1105_v26 = vpop.permute.xlu1 %1104 }
0x1217   : > { %v1107_v27 = vmul.f32 %v1693_v25, %v1105_v26 }
0x1219   : > { %1109 = vrot.lane.b32.xlu0 %v1107_v27, %s2259_s20 }
0x1227   : > { %v1124_v33 = vpop.permute.xlu1 %1123 }
0x1228   : > { %vm1125_vm15 = vcmp.eq.s32.totalorder %v1124_v33, 1 }
0x128b   : > { %v1110_v30 = vpop.permute.xlu0 %1109 }
0x128c   : > { %v1112_v31 = vadd.f32 %v1110_v30, %v1102_v29 }
0x128e   : > { %1694 = vtanh.f32 %v1112_v31  ;;  %v1127_v57 = vsel %vm1125_vm15, %v1112_v31, %v1029_v28 }
0x1298   : > { %v1695_v32 = vpop.eup %1694 }
0x1299   : > { %1115 = vrot.lane.b32.xlu0 %v1695_v32, %s2258_s19 }
0x130b   : > { %v1116_v34 = vpop.permute.xlu0 %1115 }
0x130c   : > { %v1118_v35 = vmul.f32 %v1693_v25, %v1116_v34 }
0x130e   : > { %v2108_v37 = vsel %vm1125_vm15, %v1118_v35, %v1028_v3  ;;  %v1128_v2 = vsel %vm1125_vm15, %v1118_v35, 0.0  ;;  %v1473_v3 = vpack.c.bf16 %v638_v63, %v638_v63 }
0x130f   : > { %v1145_v39 = vpack.c.bf16 %v2108_v37, %v2108_v37  ;;  %v1478_v53 = vpack.c.bf16 %v1128_v2, %v1128_v2 }
0x1311   : > { %1147 = vrot.lane.b32.xlu1 %v1145_v39, %s2259_s20 }
0x1383   : > { %v1148_v41 = vpop.permute.xlu1 %1147 }
0x1384   : > { %1583 = vmatmul.mubr.msk.bf16.vlgmr.msra.gmra.mrb[16].mxu1 %vm343_vm0, %v1148_v41 }
0x1457   : > { %v1186_v44 = vpop.f32.mrb[16].mxu1 }
0x1458   : > { %v1192_v45 = vadd.f32 %v1186_v44, %v1144_v43  ;;  %v1584_v46 = vpop.f32.mrb[17].mxu1 }
0x1459   : > { %v1189_v4 = vpop.f32.mrb[18].mxu1 }
0x145a   : > { %1696 = vtanh.f32 %v1192_v45  ;;  %v1585_v47 = vpop.f32.mrb[19].mxu1  ;;  %v1462_v40 = vmul.f32 -1.442695, %v1192_v45 }
0x145c   : > { %1698 = vpow2.f32 %v1462_v40 }
0x1464   : > { %v1697_v49 = vpop.eup %1696 }
0x1465   : > { %1202 = vrot.lane.b32.xlu0 %v1697_v49, %s2258_s19 }
0x1469   : > { %1221 = vperm.xlu0 %1631, %v1219_v1  }
0x146d   : > { %546 = vrot.lane.b32.xlu0 %v1935_v51, %s2259_s20  ;;  %v1699_v51 = vpop.eup %1698 }
0x146e   : > { %v1196_v42 = vadd.f32 1.0, %v1699_v51 }
0x1470   : > { %1700 = vrcp.f32 %v1196_v42 }
0x1471   : > { %741 = vrot.lane.b32.xlu0 %v1474_v50, %s2259_s20 }
0x1475   : > { %937 = vrot.lane.b32.xlu0 %v1476_v10, %s2259_s20 }
0x1479   : > { %1133 = vrot.lane.b32.xlu0 %v1478_v53, %s2259_s20 }
0x147a   : > { %v1701_v54 = vpop.eup %1700 }
0x147b   : > { %v1200_v58 = vmul.f32 %v1701_v54, %v1127_v57 }
0x14d7   : > { %v1203_v36 = vpop.permute.xlu0 %1202 }
0x14d8   : > { %v1205_v38 = vmul.f32 %v1701_v54, %v1203_v36 }
0x14da   : > { %1207 = vrot.lane.b32.xlu1 %v1205_v38, %s2259_s20 }
0x14e8   : > { %v1222_v55 = vpop.permute.xlu0 %1221 }
0x14e9   : > { %vm1223_vm3 = vcmp.eq.s32.totalorder %v1222_v55, 1 }
0x14ec   : > { %v547_v56 = vpop.permute.xlu0 %546 }
0x14ed   : > { %554 = vst.msk [vmem:[%s552_s2] sm:$0xf] %vm553_vm2, %v547_v56  ;;  %s646_s2 = sshra.s32 %s2274_s1, 3  ;;  %s2278_s1 = sshll.u32 %s2069_s16, 3 }
0x14ee   : > { %s1434_s19 = sshll.u32 %s646_s2, 2  ;;  %s1038_s14 = sshra.s32 %s2278_s1, 3 }
0x14ef   : > { %s649_s4 = scalar_lea.vmem %s2144_s0, %s1434_s19  ;;  %s2279_s2 = smov 32  }
0x14f0   : > { %v742_v7 = vpop.permute.xlu0 %741  ;;  %s1454_s16 = sshll.u32 %s1038_s14, 2  ;;  %s1464_s1 = sshll.u32 %s1233_s12, 2 }
0x14f4   : > { %v938_v15 = vpop.permute.xlu0 %937 }
0x14f8   : > { %v1134_v19 = vpop.permute.xlu0 %1133 }
0x154c   : > { %v1208_v59 = vpop.permute.xlu1 %1207 }
0x154d   : > { %v1210_v60 = vadd.f32 %v1208_v59, %v1200_v58 }
0x154f   : > { %1702 = vtanh.f32 %v1210_v60 }
0x1559   : > { %v1703_v61 = vpop.eup %1702 }
0x155a   : > { %1213 = vrot.lane.b32.xlu1 %v1703_v61, %s2273_s11  ;;  %s2277_s11 = sshll.u32 %s2039_s18, 3  ;;  %s2280_s18 = sshll.u32 %s2094_s29, 3 }
0x155b   : > { %s940_s3 = sshra.s32 %s2277_s11, 3  ;;  %s1136_s10 = sshra.s32 %s2280_s18, 3 }
0x155c   : > { %s1449_s9 = sshll.u32 %s940_s3, 2  ;;  %s1459_s19 = sshll.u32 %s1136_s10, 2 }
0x155d   : > { %s943_s3 = scalar_lea.vmem %s2144_s0, %s1449_s9  ;;  %s1466_s11 = sshll.u32 %s1830_s25, 7 }
0x155e   : > { %643 = vrot.lane.b32.xlu1 %v1473_v3, %s2259_s20  ;;  %s2196_s18 = scalar_lea.hbm %s2250_s6, %s1466_s11  ;;  %s2201_s10 = scalar_lea.vmem %s2144_s0, %s1464_s1 }
0x1562   : > { %839 = vrot.lane.b32.xlu1 %v1475_v8, %s2259_s20 }
0x1566   : > { %1035 = vrot.lane.b32.xlu1 %v1477_v14, %s2259_s20  ;;  %s747_s20 = scalar_lea.vmem %s2144_s0, %s1439_s28  ;;  %s1041_s28 = scalar_lea.vmem %s2144_s0, %s1454_s16 }
0x15cc   : > { %v1214_v16 = vpop.permute.xlu1 %1213 }
0x15cd   : > { %v1216_v9 = vmul.f32 %v1701_v54, %v1214_v16 }
0x15cf   : > { %v1225_v62 = vsel %vm1223_vm3, %v1216_v9, 0.0  ;;  %v1224_v0 = vsel %vm1223_vm3, %v1216_v9, %v2108_v37 }
0x15d0   : > { %v1479_v12 = vpack.c.bf16 %v1225_v62, %v1225_v62  ;;  %1239 = vrot.lane.b32.xlu1 %v1224_v0, %s2279_s2  ;;  %v644_v13 = vpop.permute.xlu1 %643 }
0x15d1   : > { %650 = vst.msk [vmem:[%s649_s4] sm:$0xf] %vm553_vm2, %v644_v13  ;;  %s1139_s4 = scalar_lea.vmem %s2144_s0, %s1459_s19 }
0x15d2   : > { %748 = vst.msk [vmem:[%s747_s20] sm:$0xf] %vm553_vm2, %v742_v7  ;;  %1230 = vrot.lane.b32.xlu0 %v1479_v12, %s2279_s2  ;;  %s276_s20 = sand.u32 1, %s1758_s22  }
0x15d3   : > { %s1406_s29 = sshll.u32 %s276_s20, 3  ;;  %s1249_s25 = scalar_lea.sflag [#allocation4], %s276_s20 }
0x15d4   : > { %v840_v17 = vpop.permute.xlu1 %839  ;;  %s278_s26 = scalar_lea.vmem [#allocation3], %s1406_s29 }
0x15d5   : > { %846 = vst.msk [vmem:[%s845_s17] sm:$0xf] %vm553_vm2, %v840_v17  ;;  %s1265_s9 = sshll.u32 %s278_s26, 4  ;;  %s1773_s17 = smov [#allocation3]   ;;  %s2198_s9 = int_to_ptr.vmem [resolvable:$true] %s1265_s9 }
0x15d6   : > { %944 = vst.msk [vmem:[%s943_s3] sm:$0xf] %vm553_vm2, %v938_v15  ;;  %s1704_s15 = scalar_lea.vmem %s2198_s9, 128  ;;  %s1708_s3 = sshll.u32 %s1773_s17, 4  ;;  %s1709_s3 = int_to_ptr.vmem [resolvable:$false] %s1708_s3 }
0x15d7   : > { %p1705_p12 = scmp.ne.s32.totalorder %s2198_s9, %s1704_s15  ;;  %s1710_s16 = scalar_lea.vmem %s1709_s3, 256 }
0x15d8   : > { %v1036_v18 = vpop.permute.xlu1 %1035  ;;  %p1711_p1 = scmp.lt.s32.totalorder %s2198_s9, %s1709_s3  ;;  %p1712_p2 = scmp.lt.s32.totalorder %s1710_s16, %s1704_s15 }
0x15d9   : > { %1042 = vst.msk [vmem:[%s1041_s28] sm:$0xf] %vm553_vm2, %v1036_v18  ;;  %p1706_p13 = pnand %p1705_p12, %p1847_p5 }
0x15da   : > { %1140 = vst.msk [vmem:[%s1139_s4] sm:$0xf] %vm553_vm2, %v1134_v19  ;;  %p1713_p3 = por %p1712_p2, %p1711_p1 }
0x15db   : > { %p1707_p0 = pneg %p1706_p13 }
0x15dd   : > { %p1714_p4 = pnand %p1713_p3, %p1707_p0 }
0x1642   : > { %v1240_v20 = vpop.permute.xlu1 %1239 }
0x1643   : > { %1242 = vst.msk [vmem:[%s278_s26] sm:$0xff] %vm343_vm0, %v1240_v20 }
0x1644   : > { %v1231_v21 = vpop.permute.xlu0 %1230 }
0x1645   : > { %1717 = shalt.err (!%p1714_p4)
}
0x1646   : > { %s1718_s0 = scalar_lea.hbm %s2196_s18, 128  ;;  %s1722_s4 = scalar_lea.hbm %s2250_s6, 256 }
0x1647   : > { %p1719_p7 = scmp.ne.s32.totalorder %s2196_s18, %s1718_s0  ;;  %p1723_p10 = scmp.lt.u32.totalorder %s2196_s18, %s2250_s6 }
0x1648   : > { %p1724_p11 = scmp.lt.u32.totalorder %s1722_s4, %s1718_s0  ;;  %p1726_p13 = scmp.lt.u32.totalorder %s1718_s0, %s2196_s18 }
0x1649   : > { %p1720_p8 = pnand %p1719_p7, %p1847_p5 }
0x164a   : > { %p1725_p12 = por %p1724_p11, %p1723_p10 }
0x164b   : > { %p1721_p9 = pneg %p1720_p8 }
0x164c   : > { %p1727_p0 = por %p1726_p13, %p1725_p12 }
0x164e   : > { %p1728_p1 = pnand %p1727_p0, %p1721_p9 }
0x1650   : > { %1731 = shalt.err (!%p1728_p1)
}
0x1651   : > { %1586 = dma.vmem_to_hbm [thread:$0]  (%p1847_p5), %s2198_s9, 128, %s2196_s18, %s1249_s25   ;;  %1237 = vst.msk [vmem:[%s2201_s10] sm:$0xf] %vm553_vm2, %v1231_v21 }
0x1652 PF: > { %p1592_p2 = scmp.ge.s32.totalorder %s1766_s24, 2  ;;  %s1285_s13 = sand.u32 1, %s1754_s21  }
0x1653   : > { %s1286_s12 = scalar_lea.sflag [#allocation4], %s1285_s13 }
0x1654   : > { %p1589_p3 = pnand %p1592_p2, %p1851_p6 }
0x1656   : > { %1749 = dma.done.wait (!%p1589_p3), %s1286_s12, 128  }
0x1657   : > { %1751 = vsyncadd (!%p1589_p3), %s1286_s12, 4294967168  ;;  %p17_p4 = scmp.ge.s32.totalorder %s1834_s27, 4   ;;  %s2282_s21 = smov %s1758_s22 }
0x1658   : > { %s2283_s22 = smov %s1762_s23  ;;  %s2284_s23 = smov %s1845_s30 }
0x1659   : > { %s2285_s24 = smov %s1834_s27  ;;  %19 = sbr.rel (!%p17_p4) target bundleno = 9 (0x9), region = 109 }
0x1660   :  { %1291 = vsyncpa [#allocation4], 1 }
0x1661   :  { %1293 = vsyncpa [#allocation4 + $0x1], 1 }

</bundles_post_ra>
